<compile_context>
chip_gen: v5e
topology: v5e:2x2
jax: 0.10.0
libtpu: 0.0.40
codegen_flags: <defaults>
</compile_context>

<pallas_src>
import jax
import jax.numpy as jnp
from jax.experimental import pallas as pl
from jax.experimental.pallas import tpu as pltpu

HP = 128   # lane-padded hidden block (one 128-lane vreg-width per h_l / c_l)
GP = 128   # lane-padded per-gate block


def lstm_step_kernel(tok_ref, emb_ref, hc_ref, w_ih_ref, w_hh_ref, b_g_ref,
                     w_dec_ref, b_dec_ref, out_ref, hc_out_ref):
    """One LSTM time step over L layers + linear decoder.

    tok_ref   : (B, 1)  int32 token ids
    emb_ref   : (V, HP) bf16 embedding table (cols H..HP-1 zero)
    hc_ref    : (B, 2*L*HP) f32 packed state: block l = h_l, block L+l = c_l
    w_ih_ref  : (L, HP, 4*GP) bf16  W_ih^T, gate blocks ordered [i|f|o|g]
    w_hh_ref  : (L, HP, 4*GP) bf16  W_hh^T, same layout
    b_g_ref   : (L, 1, 4*GP)  f32   b_ih + b_hh, same layout (pad lanes zero)
    w_dec_ref : (HP, OP) bf16 decoder weight (transposed, lane-padded)
    b_dec_ref : (1, OP)  f32  decoder bias (lane-padded)
    out_ref   : (B, OP)  f32  decoder output (lane-dense, padded)
    hc_out_ref: (B, 2*L*HP) f32 new packed state (HBM-aliased onto hc input)
    """
    B = tok_ref.shape[0]
    V = emb_ref.shape[0]
    L = w_ih_ref.shape[0]

    # ---- in-kernel embedding gather via one-hot MXU matmul -----------------
    tok = tok_ref[...]                                            # (B, 1) i32
    vocab_iota = jax.lax.broadcasted_iota(jnp.int32, (B, V), 1)
    one_hot = jnp.where(tok == vocab_iota, 1.0, 0.0).astype(jnp.bfloat16)
    x = jnp.dot(one_hot, emb_ref[...],
                preferred_element_type=jnp.float32).astype(jnp.bfloat16)

    # ---- L unrolled LSTM layers (L is small & static) ----------------------
    for l in range(L):
        h_prev = hc_ref[:, l * HP:(l + 1) * HP]                   # (B, HP) f32
        c_prev = hc_ref[:, (L + l) * HP:(L + l + 1) * HP]
        # Split matmuls (no lane concat of [x, h] on the serial layer chain).
        gates = (jnp.dot(x, w_ih_ref[l], preferred_element_type=jnp.float32)
                 + jnp.dot(h_prev.astype(jnp.bfloat16), w_hh_ref[l],
                           preferred_element_type=jnp.float32)
                 + b_g_ref[l])                                    # (B, 4*GP) f32
        # Gate blocks are 128-lane aligned in order [i | f | o | g]:
        # sigmoid over the first 3 blocks, tanh over the last one only.
        sig = jax.nn.sigmoid(gates[:, :3 * GP])
        g_g = jnp.tanh(gates[:, 3 * GP:])
        i_g = sig[:, 0 * GP:1 * GP]
        f_g = sig[:, 1 * GP:2 * GP]
        o_g = sig[:, 2 * GP:3 * GP]
        c_new = f_g * c_prev + i_g * g_g                          # f32 state math
        h_new = o_g * jnp.tanh(c_new)
        # Whole-vreg, 128-lane-aligned state stores (disjoint per layer).
        hc_out_ref[:, l * HP:(l + 1) * HP] = h_new
        hc_out_ref[:, (L + l) * HP:(L + l + 1) * HP] = c_new
        x = h_new.astype(jnp.bfloat16)                            # next layer in

    # ---- decoder (lane-dense padded output) --------------------------------
    out_ref[...] = (jnp.dot(x, w_dec_ref[...],
                            preferred_element_type=jnp.float32)
                    + b_dec_ref[...])


def _full_spec(shape):
    # Whole-array block (grid of size 1) -> satisfies TPU tiling rules.
    ndim = len(shape)
    return pl.BlockSpec(shape, lambda *_: (0,) * ndim)


@jax.jit
def rnn_step_packed(tokens, hc, params):
    """One decode step on the packed (B, 2*L*HP) state slab."""
    emb = params["embedding"]                 # (V, HP) bf16
    w_ih = params["w_ih_t"]                   # (L, HP, 4*GP) bf16
    w_hh = params["w_hh_t"]                   # (L, HP, 4*GP) bf16
    b_g = params["b_gates"]                   # (L, 1, 4*GP) f32
    w_dec = params["w_dec"]                   # (HP, OP) bf16
    b_dec = params["b_dec"]                   # (1, OP) f32

    B = hc.shape[0]
    OP = w_dec.shape[1]
    tok2d = tokens.reshape(B, 1).astype(jnp.int32)

    inputs = (tok2d, emb, hc, w_ih, w_hh, b_g, w_dec, b_dec)
    out_shapes = (
        jax.ShapeDtypeStruct((B, OP), jnp.float32),
        jax.ShapeDtypeStruct(hc.shape, jnp.float32),
    )
    # NOTE: grid=(1,) single program; at B>=16 on v7x a leading "parallel"
    # batch axis would use both TensorCores.  Whole-array blocks are fine at
    # this model size (~0.6 MiB VMEM); re-tile w_* if hidden_size scales up.
    out_pad, hc_new = pl.pallas_call(
        lstm_step_kernel,
        out_shape=out_shapes,
        grid=(1,),
        in_specs=[_full_spec(a.shape) for a in inputs],
        out_specs=(_full_spec((B, OP)), _full_spec(hc.shape)),
        # Packed h/c state is updated in place (input 2 -> output 1).
        input_output_aliases={2: 1},
        compiler_params=pltpu.CompilerParams(
            dimension_semantics=("arbitrary",)),
    )(*inputs)
    return out_pad, hc_new


# ---------------------------------------------------------------------------
# State packing (done once at sequence boundaries, not per step).
# ---------------------------------------------------------------------------
def pack_state(hidden, carry):
    """(L, B, H) hidden/carry -> packed, lane-padded (B, 2*L*HP) slab."""
    L, B, H = hidden.shape

    def _pack(x):
        xp = jnp.pad(x, ((0, 0), (0, 0), (0, HP - H)))            # (L, B, HP)
        return jnp.transpose(xp, (1, 0, 2)).reshape(B, L * HP)

    return jnp.concatenate([_pack(hidden), _pack(carry)], axis=-1)


def unpack_state(hc, num_layers, hidden_size):
    """Packed (B, 2*L*HP) slab -> ((L, B, H), (L, B, H))."""
    B = hc.shape[0]
    L = num_layers
    h = hc[:, :L * HP].reshape(B, L, HP)[:, :, :hidden_size].transpose(1, 0, 2)
    c = hc[:, L * HP:].reshape(B, L, HP)[:, :, :hidden_size].transpose(1, 0, 2)
    return h, c


def rnn_forward(x_tokens, hidden, carry, params, *, output_size):
    """Module-faithful API: RNN.forward(x, hidden, carry).

    For decode loops, prefer rnn_step_packed + pack_state/unpack_state at the
    sequence boundaries (keeps the state slab packed across steps).
    """
    L = hidden.shape[0]
    H = hidden.shape[2]
    hc = pack_state(hidden, carry)
    out_pad, hc_new = rnn_step_packed(x_tokens, hc, params)
    h_new, c_new = unpack_state(hc_new, L, H)
    return out_pad[:, :output_size], (h_new, c_new)


# ---------------------------------------------------------------------------
# Parameter init (PyTorch layout) and packing into the kernel layout.
# ---------------------------------------------------------------------------
def init_params(key, input_size, hidden_size, num_layers, output_size):
    H, L, O = hidden_size, num_layers, output_size
    scale = 1.0 / jnp.sqrt(jnp.float32(H))
    keys = jax.random.split(key, 7)

    def u(k, shape):
        return jax.random.uniform(k, shape, jnp.float32, -scale, scale)

    return {
        "embedding": jax.random.normal(keys[0], (input_size, H), jnp.float32),
        "w_ih": u(keys[1], (L, 4 * H, H)),     # PyTorch layout (4H, in), [i,f,g,o]
        "w_hh": u(keys[2], (L, 4 * H, H)),
        "b_ih": u(keys[3], (L, 4 * H)),
        "b_hh": u(keys[4], (L, 4 * H)),
        "w_dec": u(keys[5], (O, H)),           # PyTorch Linear layout (out, in)
        "b_dec": u(keys[6], (O,)),
    }


def pack_params(raw, output_size):
    """Reorder gates to [i,f,o,g], transpose, and lane-pad to 128-lane blocks."""
    w_ih, w_hh = raw["w_ih"], raw["w_hh"]
    L, four_h, H = w_ih.shape
    assert four_h == 4 * H and H <= HP
    gate_src = (0, 1, 3, 2)   # dst block [i,f,o,g] <- PyTorch src block [i,f,g,o]

    def pack_w(w):            # (L, 4H, H) -> (L, HP, 4*GP), zero pad lanes/rows
        out = jnp.zeros((L, HP, 4 * GP), jnp.float32)
        for dst, src in enumerate(gate_src):
            blk = jnp.swapaxes(w[:, src * H:(src + 1) * H, :], 1, 2)  # (L, H, H)
            out = out.at[:, :H, dst * GP:dst * GP + H].set(blk)
        return out

    def pack_b(b):            # (L, 4H) -> (L, 1, 4*GP), zero pad lanes
        out = jnp.zeros((L, 1, 4 * GP), jnp.float32)
        for dst, src in enumerate(gate_src):
            out = out.at[:, 0, dst * GP:dst * GP + H].set(
                b[:, src * H:(src + 1) * H])
        return out

    V = raw["embedding"].shape[0]
    emb = jnp.zeros((V, HP), jnp.float32).at[:, :H].set(raw["embedding"])

    O = output_size
    OP = max(GP, ((O + 127) // 128) * 128)
    w_dec = jnp.zeros((HP, OP), jnp.float32).at[:H, :O].set(raw["w_dec"].T)
    b_dec = jnp.zeros((1, OP), jnp.float32).at[:, :O].set(raw["b_dec"])

    return {
        "embedding": emb.astype(jnp.bfloat16),            # MXU operand
        "w_ih_t": pack_w(w_ih).astype(jnp.bfloat16),
        "w_hh_t": pack_w(w_hh).astype(jnp.bfloat16),
        "b_gates": pack_b(raw["b_ih"] + raw["b_hh"]),     # f32
        "w_dec": w_dec.astype(jnp.bfloat16),
        "b_dec": b_dec,                                   # f32
    }


# ---------------------------------------------------------------------------
# Pure-JAX reference mirroring the kernel numerics (bf16 MXU operands,
# f32 accumulation / elementwise), on the packed layout.
# ---------------------------------------------------------------------------
def rnn_reference_packed(tokens, hc, params):
    f32 = jnp.float32
    hi = jax.lax.Precision.HIGHEST
    bf = lambda a: a.astype(jnp.bfloat16).astype(f32)

    emb = params["embedding"].astype(f32)[tokens]          # (B, HP)
    w_ih = params["w_ih_t"].astype(f32)
    w_hh = params["w_hh_t"].astype(f32)
    b_g = params["b_gates"]
    w_dec = params["w_dec"].astype(f32)
    b_dec = params["b_dec"]
    L = w_ih.shape[0]

    x = emb
    hs, cs = [], []
    for l in range(L):
        h_prev = hc[:, l * HP:(l + 1) * HP]
        c_prev = hc[:, (L + l) * HP:(L + l + 1) * HP]
        gates = (jnp.dot(bf(x), w_ih[l], precision=hi)
                 + jnp.dot(bf(h_prev), w_hh[l], precision=hi) + b_g[l])
        i_g = jax.nn.sigmoid(gates[:, 0 * GP:1 * GP])
        f_g = jax.nn.sigmoid(gates[:, 1 * GP:2 * GP])
        o_g = jax.nn.sigmoid(gates[:, 2 * GP:3 * GP])
        g_g = jnp.tanh(gates[:, 3 * GP:])
        c_new = f_g * c_prev + i_g * g_g
        h_new = o_g * jnp.tanh(c_new)
        hs.append(h_new)
        cs.append(c_new)
        x = h_new
    out = jnp.dot(bf(x), w_dec, precision=hi) + b_dec
    return out, jnp.concatenate(hs + cs, axis=-1)


if __name__ == "__main__":
    input_size = 32      # vocab size
    hidden_size = 32
    num_layers = 2
    output_size = 16
    batch = 8

    key = jax.random.PRNGKey(0)
    k_params, k_x, k_seq = jax.random.split(key, 3)
    raw_params = init_params(k_params, input_size, hidden_size, num_layers,
                             output_size)
    params = pack_params(raw_params, output_size)

    x = jax.random.randint(k_x, (batch,), 0, input_size, dtype=jnp.int32)
    # init_hidden equivalent
    hidden = jnp.zeros((num_layers, batch, hidden_size), jnp.float32)
    carry = jnp.zeros((num_layers, batch, hidden_size), jnp.float32)

    # 1) Module-faithful single forward step.
    out, (h_new, c_new) = rnn_forward(x, hidden, carry, params,
                                      output_size=output_size)
    jax.block_until_ready((out, h_new, c_new))

    assert out.shape == (batch, output_size)
    assert h_new.shape == (num_layers, batch, hidden_size)
    assert c_new.shape == (num_layers, batch, hidden_size)
    assert bool(jnp.all(jnp.isfinite(out)))

    hc0 = pack_state(hidden, carry)
    out_r, hc_r = rnn_reference_packed(x, hc0, params)
    h_r, c_r = unpack_state(hc_r, num_layers, hidden_size)
    assert bool(jnp.allclose(out, out_r[:, :output_size], atol=1e-2, rtol=1e-2))
    assert bool(jnp.allclose(h_new, h_r, atol=1e-2, rtol=1e-2))
    assert bool(jnp.allclose(c_new, c_r, atol=1e-2, rtol=1e-2))

    # 2) Short decode loop with the state kept packed across steps
    #    (no per-step (L,B,H)<->slab re-packing, state aliased in place).
    T = 4
    toks_seq = jax.random.randint(k_seq, (T, batch), 0, input_size,
                                  dtype=jnp.int32)
    hc = hc0
    hc_chk = hc0
    out_p = out_chk = None
    for t in range(T):
        out_p, hc = rnn_step_packed(toks_seq[t], hc, params)
        out_chk, hc_chk = rnn_reference_packed(toks_seq[t], hc_chk, params)
    jax.block_until_ready((out_p, hc))
    assert bool(jnp.allclose(out_p, out_chk, atol=1e-2, rtol=1e-2))
    assert bool(jnp.allclose(hc, hc_chk, atol=1e-2, rtol=1e-2))
    # Lane-pad regions of the state slab must stay (numerically) zero.
    pad = hc.reshape(batch, 2 * num_layers, HP)[:, :, hidden_size:]
    assert bool(jnp.all(jnp.abs(pad) < 1e-6))

    print("KERNEL_OK")
</pallas_src>

<mosaic_0001>
module attributes {stable_mosaic.version = 11 : i64} {
  func.func @lstm_step_kernel(%arg0: i32, %arg1: memref<8x1xi32, #tpu.memory_space<vmem>>, %arg2: memref<32x128xbf16, #tpu.memory_space<vmem>>, %arg3: memref<8x512xf32, #tpu.memory_space<vmem>>, %arg4: memref<2x128x512xbf16, #tpu.memory_space<vmem>>, %arg5: memref<2x128x512xbf16, #tpu.memory_space<vmem>>, %arg6: memref<2x1x512xf32, #tpu.memory_space<vmem>>, %arg7: memref<128x128xbf16, #tpu.memory_space<vmem>>, %arg8: memref<1x128xf32, #tpu.memory_space<vmem>>, %arg9: memref<8x128xf32, #tpu.memory_space<vmem>>, %arg10: memref<8x512xf32, #tpu.memory_space<vmem>>) attributes {dimension_semantics = [#tpu.dimension_semantics<arbitrary>], iteration_bounds = array<i64: 1>, scalar_prefetch = 0 : i64, scratch_operands = 0 : i64, tpu.core_type = #tpu.core_type<tc>, window_params = [{pipeline_mode = #tpu.pipeline_mode<synchronous>, transform_indices = @transform_0, window_bounds = array<i64: 8, 1>}, {pipeline_mode = #tpu.pipeline_mode<synchronous>, transform_indices = @transform_1, window_bounds = array<i64: 32, 128>}, {pipeline_mode = #tpu.pipeline_mode<synchronous>, transform_indices = @transform_2, window_bounds = array<i64: 8, 512>}, {pipeline_mode = #tpu.pipeline_mode<synchronous>, transform_indices = @transform_3, window_bounds = array<i64: 2, 128, 512>}, {pipeline_mode = #tpu.pipeline_mode<synchronous>, transform_indices = @transform_4, window_bounds = array<i64: 2, 128, 512>}, {pipeline_mode = #tpu.pipeline_mode<synchronous>, transform_indices = @transform_5, window_bounds = array<i64: 2, 1, 512>}, {pipeline_mode = #tpu.pipeline_mode<synchronous>, transform_indices = @transform_6, window_bounds = array<i64: 128, 128>}, {pipeline_mode = #tpu.pipeline_mode<synchronous>, transform_indices = @transform_7, window_bounds = array<i64: 1, 128>}, {pipeline_mode = #tpu.pipeline_mode<synchronous>, transform_indices = @transform_8, window_bounds = array<i64: 8, 128>}, {pipeline_mode = #tpu.pipeline_mode<synchronous>, transform_indices = @transform_9, window_bounds = array<i64: 8, 512>}]} {
    %c0 = arith.constant 0 : index
    %c0_0 = arith.constant 0 : index
    %0 = vector.load %arg1[%c0, %c0_0] : memref<8x1xi32, #tpu.memory_space<vmem>>, vector<8x1xi32>
    %1 = tpu.iota {dimensions = array<i32: 1>} : vector<8x32xi32>
    %2 = vector.broadcast %0 : vector<8x1xi32> to vector<8x32xi32>
    %3 = arith.cmpi eq, %2, %1 : vector<8x32xi32>
    %cst = arith.constant 1.000000e+00 : f32
    %cst_1 = arith.constant 0.000000e+00 : f32
    %4 = vector.broadcast %cst : f32 to vector<8x32xf32>
    %5 = vector.broadcast %cst_1 : f32 to vector<8x32xf32>
    %6 = arith.select %3, %4, %5 : vector<8x32xi1>, vector<8x32xf32>
    %7 = arith.truncf %6 : vector<8x32xf32> to vector<8x32xbf16>
    %c0_2 = arith.constant 0 : index
    %c0_3 = arith.constant 0 : index
    %8 = vector.load %arg2[%c0_2, %c0_3] : memref<32x128xbf16, #tpu.memory_space<vmem>>, vector<32x128xbf16>
    %cst_4 = arith.constant dense<0.000000e+00> : vector<8x128xf32>
    %9 = tpu.matmul %7, %8, %cst_4 {dimension_numbers = #tpu.dot_dimension_numbers<[1], [0], [0], [1], [0, 0, 1, 1], [], []>} : vector<8x32xbf16>, vector<32x128xbf16>, vector<8x128xf32> -> vector<8x128xf32>
    %10 = arith.truncf %9 : vector<8x128xf32> to vector<8x128xbf16>
    %c0_5 = arith.constant 0 : index
    %c0_6 = arith.constant 0 : index
    %11 = vector.load %arg3[%c0_5, %c0_6] : memref<8x512xf32, #tpu.memory_space<vmem>>, vector<8x128xf32>
    %c0_7 = arith.constant 0 : index
    %c256 = arith.constant 256 : index
    %12 = vector.load %arg3[%c0_7, %c256] : memref<8x512xf32, #tpu.memory_space<vmem>>, vector<8x128xf32>
    %c0_8 = arith.constant 0 : index
    %c0_9 = arith.constant 0 : index
    %c0_10 = arith.constant 0 : index
    %13 = vector.load %arg4[%c0_8, %c0_9, %c0_10] : memref<2x128x512xbf16, #tpu.memory_space<vmem>>, vector<1x128x512xbf16>
    %14 = vector.shape_cast %13 : vector<1x128x512xbf16> to vector<128x512xbf16>
    %cst_11 = arith.constant dense<0.000000e+00> : vector<8x512xf32>
    %15 = tpu.matmul %10, %14, %cst_11 {dimension_numbers = #tpu.dot_dimension_numbers<[1], [0], [0], [1], [0, 0, 1, 1], [], []>} : vector<8x128xbf16>, vector<128x512xbf16>, vector<8x512xf32> -> vector<8x512xf32>
    %16 = arith.truncf %11 : vector<8x128xf32> to vector<8x128xbf16>
    %c0_12 = arith.constant 0 : index
    %c0_13 = arith.constant 0 : index
    %c0_14 = arith.constant 0 : index
    %17 = vector.load %arg5[%c0_12, %c0_13, %c0_14] : memref<2x128x512xbf16, #tpu.memory_space<vmem>>, vector<1x128x512xbf16>
    %18 = vector.shape_cast %17 : vector<1x128x512xbf16> to vector<128x512xbf16>
    %cst_15 = arith.constant dense<0.000000e+00> : vector<8x512xf32>
    %19 = tpu.matmul %16, %18, %cst_15 {dimension_numbers = #tpu.dot_dimension_numbers<[1], [0], [0], [1], [0, 0, 1, 1], [], []>} : vector<8x128xbf16>, vector<128x512xbf16>, vector<8x512xf32> -> vector<8x512xf32>
    %20 = arith.addf %15, %19 : vector<8x512xf32>
    %c0_16 = arith.constant 0 : index
    %c0_17 = arith.constant 0 : index
    %c0_18 = arith.constant 0 : index
    %21 = vector.load %arg6[%c0_16, %c0_17, %c0_18] : memref<2x1x512xf32, #tpu.memory_space<vmem>>, vector<1x1x512xf32>
    %22 = vector.shape_cast %21 : vector<1x1x512xf32> to vector<1x512xf32>
    %23 = vector.broadcast %22 : vector<1x512xf32> to vector<8x512xf32>
    %24 = arith.addf %20, %23 : vector<8x512xf32>
    %25 = vector.extract_strided_slice %24 {offsets = [0, 0], sizes = [8, 384], strides = [1, 1]} : vector<8x512xf32> to vector<8x384xf32>
    %26 = arith.negf %25 : vector<8x384xf32>
    %27 = math.exp %26 : vector<8x384xf32>
    %cst_19 = arith.constant 1.000000e+00 : f32
    %28 = vector.broadcast %cst_19 : f32 to vector<8x384xf32>
    %29 = arith.addf %28, %27 : vector<8x384xf32>
    %30 = arith.divf %28, %29 : vector<8x384xf32>
    %31 = vector.extract_strided_slice %24 {offsets = [0, 384], sizes = [8, 128], strides = [1, 1]} : vector<8x512xf32> to vector<8x128xf32>
    %32 = math.tanh %31 : vector<8x128xf32>
    %33 = vector.extract_strided_slice %30 {offsets = [0, 0], sizes = [8, 128], strides = [1, 1]} : vector<8x384xf32> to vector<8x128xf32>
    %34 = vector.extract_strided_slice %30 {offsets = [0, 128], sizes = [8, 128], strides = [1, 1]} : vector<8x384xf32> to vector<8x128xf32>
    %35 = vector.extract_strided_slice %30 {offsets = [0, 256], sizes = [8, 128], strides = [1, 1]} : vector<8x384xf32> to vector<8x128xf32>
    %36 = arith.mulf %34, %12 : vector<8x128xf32>
    %37 = arith.mulf %33, %32 : vector<8x128xf32>
    %38 = arith.addf %36, %37 : vector<8x128xf32>
    %39 = math.tanh %38 : vector<8x128xf32>
    %40 = arith.mulf %35, %39 : vector<8x128xf32>
    %c0_20 = arith.constant 0 : index
    %c0_21 = arith.constant 0 : index
    %41 = vector.load %arg10[%c0_20, %c0_21] : memref<8x512xf32, #tpu.memory_space<vmem>>, vector<8x128xf32>
    tpu.vector_store %arg10[%c0_20, %c0_21], %40 {strides = array<i32>} : memref<8x512xf32, #tpu.memory_space<vmem>>, vector<8x128xf32>,
    %c0_22 = arith.constant 0 : index
    %c256_23 = arith.constant 256 : index
    %42 = vector.load %arg10[%c0_22, %c256_23] : memref<8x512xf32, #tpu.memory_space<vmem>>, vector<8x128xf32>
    tpu.vector_store %arg10[%c0_22, %c256_23], %38 {strides = array<i32>} : memref<8x512xf32, #tpu.memory_space<vmem>>, vector<8x128xf32>,
    %43 = arith.truncf %40 : vector<8x128xf32> to vector<8x128xbf16>
    %c0_24 = arith.constant 0 : index
    %c128 = arith.constant 128 : index
    %44 = vector.load %arg3[%c0_24, %c128] : memref<8x512xf32, #tpu.memory_space<vmem>>, vector<8x128xf32>
    %c0_25 = arith.constant 0 : index
    %c384 = arith.constant 384 : index
    %45 = vector.load %arg3[%c0_25, %c384] : memref<8x512xf32, #tpu.memory_space<vmem>>, vector<8x128xf32>
    %c1 = arith.constant 1 : index
    %c0_26 = arith.constant 0 : index
    %c0_27 = arith.constant 0 : index
    %46 = vector.load %arg4[%c1, %c0_26, %c0_27] : memref<2x128x512xbf16, #tpu.memory_space<vmem>>, vector<1x128x512xbf16>
    %47 = vector.shape_cast %46 : vector<1x128x512xbf16> to vector<128x512xbf16>
    %cst_28 = arith.constant dense<0.000000e+00> : vector<8x512xf32>
    %48 = tpu.matmul %43, %47, %cst_28 {dimension_numbers = #tpu.dot_dimension_numbers<[1], [0], [0], [1], [0, 0, 1, 1], [], []>} : vector<8x128xbf16>, vector<128x512xbf16>, vector<8x512xf32> -> vector<8x512xf32>
    %49 = arith.truncf %44 : vector<8x128xf32> to vector<8x128xbf16>
    %c1_29 = arith.constant 1 : index
    %c0_30 = arith.constant 0 : index
    %c0_31 = arith.constant 0 : index
    %50 = vector.load %arg5[%c1_29, %c0_30, %c0_31] : memref<2x128x512xbf16, #tpu.memory_space<vmem>>, vector<1x128x512xbf16>
    %51 = vector.shape_cast %50 : vector<1x128x512xbf16> to vector<128x512xbf16>
    %cst_32 = arith.constant dense<0.000000e+00> : vector<8x512xf32>
    %52 = tpu.matmul %49, %51, %cst_32 {dimension_numbers = #tpu.dot_dimension_numbers<[1], [0], [0], [1], [0, 0, 1, 1], [], []>} : vector<8x128xbf16>, vector<128x512xbf16>, vector<8x512xf32> -> vector<8x512xf32>
    %53 = arith.addf %48, %52 : vector<8x512xf32>
    %c1_33 = arith.constant 1 : index
    %c0_34 = arith.constant 0 : index
    %c0_35 = arith.constant 0 : index
    %54 = vector.load %arg6[%c1_33, %c0_34, %c0_35] : memref<2x1x512xf32, #tpu.memory_space<vmem>>, vector<1x1x512xf32>
    %55 = vector.shape_cast %54 : vector<1x1x512xf32> to vector<1x512xf32>
    %56 = vector.broadcast %55 : vector<1x512xf32> to vector<8x512xf32>
    %57 = arith.addf %53, %56 : vector<8x512xf32>
    %58 = vector.extract_strided_slice %57 {offsets = [0, 0], sizes = [8, 384], strides = [1, 1]} : vector<8x512xf32> to vector<8x384xf32>
    %59 = arith.negf %58 : vector<8x384xf32>
    %60 = math.exp %59 : vector<8x384xf32>
    %cst_36 = arith.constant 1.000000e+00 : f32
    %61 = vector.broadcast %cst_36 : f32 to vector<8x384xf32>
    %62 = arith.addf %61, %60 : vector<8x384xf32>
    %63 = arith.divf %61, %62 : vector<8x384xf32>
    %64 = vector.extract_strided_slice %57 {offsets = [0, 384], sizes = [8, 128], strides = [1, 1]} : vector<8x512xf32> to vector<8x128xf32>
    %65 = math.tanh %64 : vector<8x128xf32>
    %66 = vector.extract_strided_slice %63 {offsets = [0, 0], sizes = [8, 128], strides = [1, 1]} : vector<8x384xf32> to vector<8x128xf32>
    %67 = vector.extract_strided_slice %63 {offsets = [0, 128], sizes = [8, 128], strides = [1, 1]} : vector<8x384xf32> to vector<8x128xf32>
    %68 = vector.extract_strided_slice %63 {offsets = [0, 256], sizes = [8, 128], strides = [1, 1]} : vector<8x384xf32> to vector<8x128xf32>
    %69 = arith.mulf %67, %45 : vector<8x128xf32>
    %70 = arith.mulf %66, %65 : vector<8x128xf32>
    %71 = arith.addf %69, %70 : vector<8x128xf32>
    %72 = math.tanh %71 : vector<8x128xf32>
    %73 = arith.mulf %68, %72 : vector<8x128xf32>
    %c0_37 = arith.constant 0 : index
    %c128_38 = arith.constant 128 : index
    %74 = vector.load %arg10[%c0_37, %c128_38] : memref<8x512xf32, #tpu.memory_space<vmem>>, vector<8x128xf32>
    tpu.vector_store %arg10[%c0_37, %c128_38], %73 {strides = array<i32>} : memref<8x512xf32, #tpu.memory_space<vmem>>, vector<8x128xf32>,
    %c0_39 = arith.constant 0 : index
    %c384_40 = arith.constant 384 : index
    %75 = vector.load %arg10[%c0_39, %c384_40] : memref<8x512xf32, #tpu.memory_space<vmem>>, vector<8x128xf32>
    tpu.vector_store %arg10[%c0_39, %c384_40], %71 {strides = array<i32>} : memref<8x512xf32, #tpu.memory_space<vmem>>, vector<8x128xf32>,
    %76 = arith.truncf %73 : vector<8x128xf32> to vector<8x128xbf16>
    %c0_41 = arith.constant 0 : index
    %c0_42 = arith.constant 0 : index
    %77 = vector.load %arg7[%c0_41, %c0_42] : memref<128x128xbf16, #tpu.memory_space<vmem>>, vector<128x128xbf16>
    %cst_43 = arith.constant dense<0.000000e+00> : vector<8x128xf32>
    %78 = tpu.matmul %76, %77, %cst_43 {dimension_numbers = #tpu.dot_dimension_numbers<[1], [0], [0], [1], [0, 0, 1, 1], [], []>} : vector<8x128xbf16>, vector<128x128xbf16>, vector<8x128xf32> -> vector<8x128xf32>
    %c0_44 = arith.constant 0 : index
    %c0_45 = arith.constant 0 : index
    %79 = vector.load %arg8[%c0_44, %c0_45] : memref<1x128xf32, #tpu.memory_space<vmem>>, vector<1x128xf32>
    %80 = vector.broadcast %79 : vector<1x128xf32> to vector<8x128xf32>
    %81 = arith.addf %78, %80 : vector<8x128xf32>
    %c0_46 = arith.constant 0 : index
    %c0_47 = arith.constant 0 : index
    %82 = vector.load %arg9[%c0_46, %c0_47] : memref<8x128xf32, #tpu.memory_space<vmem>>, vector<8x128xf32>
    tpu.vector_store %arg9[%c0_46, %c0_47], %81 {strides = array<i32>} : memref<8x128xf32, #tpu.memory_space<vmem>>, vector<8x128xf32>,
    return
  }
  func.func @transform_0(%arg0: i32) -> (i32, i32) {
    %c0_i32 = arith.constant 0 : i32
    %c0_i32_0 = arith.constant 0 : i32
    %c0_i32_1 = arith.constant 0 : i32
    return %c0_i32, %c0_i32_0 : i32, i32
  }
  func.func @transform_1(%arg0: i32) -> (i32, i32) {
    %c0_i32 = arith.constant 0 : i32
    %c0_i32_0 = arith.constant 0 : i32
    %c0_i32_1 = arith.constant 0 : i32
    return %c0_i32, %c0_i32_0 : i32, i32
  }
  func.func @transform_2(%arg0: i32) -> (i32, i32) {
    %c0_i32 = arith.constant 0 : i32
    %c0_i32_0 = arith.constant 0 : i32
    %c0_i32_1 = arith.constant 0 : i32
    return %c0_i32, %c0_i32_0 : i32, i32
  }
  func.func @transform_3(%arg0: i32) -> (i32, i32, i32) {
    %c0_i32 = arith.constant 0 : i32
    %c0_i32_0 = arith.constant 0 : i32
    %c0_i32_1 = arith.constant 0 : i32
    %c0_i32_2 = arith.constant 0 : i32
    return %c0_i32, %c0_i32_0, %c0_i32_1 : i32, i32, i32
  }
  func.func @transform_4(%arg0: i32) -> (i32, i32, i32) {
    %c0_i32 = arith.constant 0 : i32
    %c0_i32_0 = arith.constant 0 : i32
    %c0_i32_1 = arith.constant 0 : i32
    %c0_i32_2 = arith.constant 0 : i32
    return %c0_i32, %c0_i32_0, %c0_i32_1 : i32, i32, i32
  }
  func.func @transform_5(%arg0: i32) -> (i32, i32, i32) {
    %c0_i32 = arith.constant 0 : i32
    %c0_i32_0 = arith.constant 0 : i32
    %c0_i32_1 = arith.constant 0 : i32
    %c0_i32_2 = arith.constant 0 : i32
    return %c0_i32, %c0_i32_0, %c0_i32_1 : i32, i32, i32
  }
  func.func @transform_6(%arg0: i32) -> (i32, i32) {
    %c0_i32 = arith.constant 0 : i32
    %c0_i32_0 = arith.constant 0 : i32
    %c0_i32_1 = arith.constant 0 : i32
    return %c0_i32, %c0_i32_0 : i32, i32
  }
  func.func @transform_7(%arg0: i32) -> (i32, i32) {
    %c0_i32 = arith.constant 0 : i32
    %c0_i32_0 = arith.constant 0 : i32
    %c0_i32_1 = arith.constant 0 : i32
    return %c0_i32, %c0_i32_0 : i32, i32
  }
  func.func @transform_8(%arg0: i32) -> (i32, i32) {
    %c0_i32 = arith.constant 0 : i32
    %c0_i32_0 = arith.constant 0 : i32
    %c0_i32_1 = arith.constant 0 : i32
    return %c0_i32, %c0_i32_0 : i32, i32
  }
  func.func @transform_9(%arg0: i32) -> (i32, i32) {
    %c0_i32 = arith.constant 0 : i32
    %c0_i32_0 = arith.constant 0 : i32
    %c0_i32_1 = arith.constant 0 : i32
    return %c0_i32, %c0_i32_0 : i32, i32
  }
}

</mosaic_0001>

<bundles_post_ra>
// kernel: rnn_step_packed.1
= control target key start
LH: loop header
LB: loop body
LE: loop exit
PB: predicated region body
PF: predicated region fallthrough
CT: control target
= control target key end

     0   :  { %15 = vsyncpa [#allocation3], 0  ;;  %s2449_s0 = inlined_call_operand.vmem [shape: s32[8,1], index: 0, kind: input, shape index: {}]   ;;  %s2450_s1 = inlined_call_operand.hbm [shape: bf16[32,128], index: 1, kind: input, shape index: {}]   ;;  %s2451_s2 = inlined_call_operand.hbm [shape: f32[8,512], index: 2, kind: input, shape index: {}, may-alias: {2,9}]   ;;  %s2452_s3 = inlined_call_operand.hbm [shape: bf16[2,128,512], index: 3, kind: input, shape index: {}]   ;;  %s2453_s4 = inlined_call_operand.hbm [shape: bf16[2,128,512], index: 4, kind: input, shape index: {}]   ;;  %s2454_s5 = inlined_call_operand.vmem [shape: f32[2,1,512], index: 5, kind: input, shape index: {}]   ;;  %s2455_s6 = inlined_call_operand.vmem [shape: bf16[128,128], index: 6, kind: input, shape index: {}]   ;;  %s2456_s7 = inlined_call_operand.vmem [shape: f32[1,128], index: 7, kind: input, shape index: {}]   ;;  %s2457_s8 = inlined_call_operand.hbm [shape: f32[8,128], index: 8, kind: output, shape index: {0}]   ;;  %s2458_s9 = inlined_call_operand.hbm [shape: f32[8,512], index: 9, kind: output, shape index: {1}, may-alias: {2,9}]  }
   0x1   :  { %16 = vsyncpa [#allocation6], 0 }
   0x2   :  { %17 = vsyncpa [#allocation9], 0 }
   0x3   :  { %18 = vsyncpa [#allocation4], 0  ;;  %s40_s11 = sshll.u32 %s2451_s2, 4  ;;  %s41_s11 = int_to_ptr.hbm [resolvable:$true] %s40_s11 }
   0x4   :  { %19 = vsyncpa [#allocation12], 0  ;;  %s2298_s12 = smov [#allocation5]   ;;  %s26_s16 = sshll.u32 %s2450_s1, 4  ;;  %s27_s16 = int_to_ptr.hbm [resolvable:$true] %s26_s16 }
   0x5   :  { %s42_s13 = sshll.u32 %s2298_s12, 4  ;;  %s2299_s17 = smov [#allocation2]   ;;  %s43_s13 = int_to_ptr.vmem [resolvable:$true] %s42_s13 }
   0x6   :  { %45 = dma.hbm_to_vmem [thread:$0]  %s41_s11, 512, %s43_s13, [#allocation6]  }
   0x7   :  { %s28_s18 = sshll.u32 %s2299_s17, 4  ;;  %s2300_s19 = smov 64   ;;  %s29_s18 = int_to_ptr.vmem [resolvable:$true] %s28_s18 }
   0x8   :  { %s2301_s20 = smov 4   ;;  %s50_s2 = sshll.u32 %s2452_s3, 4  ;;  %s51_s2 = int_to_ptr.hbm [resolvable:$true] %s50_s2 }
   0x9   :  { %34 = dma.hbm_to_vmem [thread:$0]  %s27_s16, 256, %s29_s18, [#allocation3], %s2300_s19, %s2300_s19, %s2301_s20  }
   0xa   :  { %s2302_s23 = smov [#allocation7]   ;;  %s63_s1 = sshll.u32 %s2453_s4, 4  ;;  %s64_s1 = int_to_ptr.hbm [resolvable:$true] %s63_s1 }
   0xb   :  { %s52_s24 = sshll.u32 %s2302_s23, 4  ;;  %s2303_s27 = smov 256   ;;  %s53_s24 = int_to_ptr.vmem [resolvable:$true] %s52_s24 }
   0xc   :  { %s2304_s28 = smov 16   ;;  %s2305_s29 = smov [#allocation8]  }
   0xd   :  { %58 = dma.hbm_to_vmem [thread:$0]  %s51_s2, 8192, %s53_s24, [#allocation6], %s2303_s27, %s2303_s27, %s2304_s28  }
   0xe   :  { %s65_s30 = sshll.u32 %s2305_s29, 4  ;;  %s66_s30 = int_to_ptr.vmem [resolvable:$true] %s65_s30 }
   0xf   :  { %71 = dma.hbm_to_vmem [thread:$0]  %s64_s1, 8192, %s66_s30, [#allocation9], %s2303_s27, %s2303_s27, %s2304_s28  }
  0x10   :  { %2288 = dma.done.wait [#allocation3], 256  }
  0x11   :  { %2289 = vsyncadd [#allocation3], 4294967040 }
  0x12   :  { %2290 = dma.done.wait [#allocation6], 8704  }
  0x13   :  { %2291 = vsyncadd [#allocation6], 4294958592 }
  0x14   :  { %2292 = dma.done.wait [#allocation9], 8192  }
  0x15   :  { %2293 = vsyncadd [#allocation9], 4294959104  ;;  %v2306_v0 = vmov 0   ;;  %v95_v1 = vld [vmem:[%s2449_s0] sm:$0xff]  ;;  %v1961_v2 = vld [vmem:[#allocation2 + $0x8] sm:$0xff]  ;;  %vm120_vm1 = vcmask 261120  }
  0x16   :  { %2110 = vset.pattern.permute.xlu0 %v2306_v0  ;;  %130 = vmatpush.bf16.msra.mxu0 %v1961_v2  ;;  %v1960_v3 = vld [vmem:[#allocation2] sm:$0xff]  ;;  %v1523_v4 = vld [vmem:[#allocation8 + $0xe0] sm:$0xf]  ;;  %v2022_v6 = vld [vmem:[#allocation8 + $0xe4] sm:$0xf]  ;;  %s1383_s29 = sshll.u32 %s2458_s9, 4  ;;  %s1384_s29 = int_to_ptr.hbm [resolvable:$true] %s1383_s29 }
  0x17   :  { %99 = vperm.xlu0 %2110, %v95_v1   ;;  %v2024_v5 = vld [vmem:[#allocation8 + $0xec] sm:$0xf0]  ;;  %v1525_v8 = vld [vmem:[#allocation8 + $0xf0] sm:$0xf0]  ;;  %v1531_v9 = vld [vmem:[#allocation8 + $0xe8] sm:$0xf] }
  0x18   :  { %v1524_v7 = vor.u32 %v2024_v5, %v1523_v4  ;;  %v2025_v10 = vld [vmem:[#allocation8 + $0xf4] sm:$0xf0]  ;;  %v1528_v11 = vor.u32 %v2022_v6, %v1525_v8  ;;  %v2023_v13 = vld [vmem:[#allocation8 + $0xec] sm:$0xf]  ;;  %v1533_v14 = vld [vmem:[#allocation8 + $0xf8] sm:$0xf0]  ;;  %v96_v8 = vlaneseq }
  0x19   :  { %v1532_v12 = vor.u32 %v2025_v10, %v1531_v9  ;;  %v1507_v15 = vld [vmem:[#allocation8 + $0xc0] sm:$0xf]  ;;  %v1536_v16 = vor.u32 %v2023_v13, %v1533_v14  ;;  %v2020_v17 = vld [vmem:[#allocation8 + $0xcc] sm:$0xf0]  ;;  %v2018_v18 = vld [vmem:[#allocation8 + $0xc4] sm:$0xf] }
  0x1a   :  { %131 = vmatpush.bf16.msra.mxu0 %v1960_v3  ;;  %365 = vmatpush.bf16.msra.mxu1 %v1524_v7  ;;  %v1509_v19 = vld [vmem:[#allocation8 + $0xd0] sm:$0xf0]  ;;  %v1508_v20 = vor.u32 %v2020_v17, %v1507_v15  ;;  %v1515_v22 = vld [vmem:[#allocation8 + $0xc8] sm:$0xf]  ;;  %v2021_v23 = vld [vmem:[#allocation8 + $0xd4] sm:$0xf0] }
  0x1b   :  { %378 = vmatpush.bf16.msra.mxu2 %v1528_v11  ;;  %391 = vmatpush.bf16.msra.mxu3 %v1532_v12  ;;  %v1512_v21 = vor.u32 %v2018_v18, %v1509_v19  ;;  %v2019_v24 = vld [vmem:[#allocation8 + $0xcc] sm:$0xf]  ;;  %v1516_v25 = vor.u32 %v2021_v23, %v1515_v22  ;;  %v1517_v26 = vld [vmem:[#allocation8 + $0xd8] sm:$0xf0]  ;;  %v1491_v27 = vld [vmem:[#allocation8 + $0xa0] sm:$0xf] }
  0x1c   :  { %v2016_v28 = vld [vmem:[#allocation8 + $0xac] sm:$0xf0]  ;;  %v1520_v29 = vor.u32 %v2019_v24, %v1517_v26  ;;  %v2014_v30 = vld [vmem:[#allocation8 + $0xa4] sm:$0xf]  ;;  %v1493_v31 = vld [vmem:[#allocation8 + $0xb0] sm:$0xf0] }
  0x1d   :  { %v1499_v32 = vld [vmem:[#allocation8 + $0xa8] sm:$0xf]  ;;  %v1492_v33 = vor.u32 %v2016_v28, %v1491_v27  ;;  %v2017_v34 = vld [vmem:[#allocation8 + $0xb4] sm:$0xf0]  ;;  %v2015_v35 = vld [vmem:[#allocation8 + $0xac] sm:$0xf]  ;;  %v1496_v37 = vor.u32 %v2014_v30, %v1493_v31 }
  0x1e   :  { %404 = vmatpush.bf16.msrb.mxu0 %v1536_v16  ;;  %366 = vmatpush.bf16.msra.mxu1 %v1508_v20  ;;  %v1501_v36 = vld [vmem:[#allocation8 + $0xb8] sm:$0xf0]  ;;  %v1500_v38 = vor.u32 %v2017_v34, %v1499_v32  ;;  %v1475_v39 = vld [vmem:[#allocation8 + $0x80] sm:$0xf]  ;;  %v2012_v40 = vld [vmem:[#allocation8 + $0x8c] sm:$0xf0] }
  0x1f   :  { %379 = vmatpush.bf16.msra.mxu2 %v1512_v21  ;;  %392 = vmatpush.bf16.msra.mxu3 %v1516_v25  ;;  %v2010_v41 = vld [vmem:[#allocation8 + $0x84] sm:$0xf]  ;;  %v1504_v42 = vor.u32 %v2015_v35, %v1501_v36  ;;  %v1477_v43 = vld [vmem:[#allocation8 + $0x90] sm:$0xf0]  ;;  %v1483_v44 = vld [vmem:[#allocation8 + $0x88] sm:$0xf]  ;;  %v1476_v48 = vor.u32 %v2012_v40, %v1475_v39 }
  0x20   :  { %v2013_v45 = vld [vmem:[#allocation8 + $0x94] sm:$0xf0]  ;;  %v2011_v46 = vld [vmem:[#allocation8 + $0x8c] sm:$0xf]  ;;  %v1485_v47 = vld [vmem:[#allocation8 + $0x98] sm:$0xf0]  ;;  %v1480_v49 = vor.u32 %v2010_v41, %v1477_v43 }
  0x21   :  { %v1484_v50 = vor.u32 %v2013_v45, %v1483_v44  ;;  %v1459_v51 = vld [vmem:[#allocation8 + $0x60] sm:$0xf]  ;;  %v2008_v52 = vld [vmem:[#allocation8 + $0x6c] sm:$0xf0]  ;;  %v2006_v53 = vld [vmem:[#allocation8 + $0x64] sm:$0xf]  ;;  %v1488_v54 = vor.u32 %v2011_v46, %v1485_v47 }
  0x22   :  { %405 = vmatpush.bf16.msrb.mxu0 %v1520_v29  ;;  %367 = vmatpush.bf16.msra.mxu1 %v1492_v33  ;;  %v1461_v55 = vld [vmem:[#allocation8 + $0x70] sm:$0xf0]  ;;  %v1467_v56 = vld [vmem:[#allocation8 + $0x68] sm:$0xf]  ;;  %v2009_v57 = vld [vmem:[#allocation8 + $0x74] sm:$0xf0]  ;;  %v1460_v60 = vor.u32 %v2008_v52, %v1459_v51 }
  0x23   :  { %380 = vmatpush.bf16.msra.mxu2 %v1496_v37  ;;  %393 = vmatpush.bf16.msra.mxu3 %v1500_v38  ;;  %v2007_v58 = vld [vmem:[#allocation8 + $0x6c] sm:$0xf]  ;;  %v1469_v59 = vld [vmem:[#allocation8 + $0x78] sm:$0xf0]  ;;  %v1464_v61 = vor.u32 %v2006_v53, %v1461_v55  ;;  %v1468_v62 = vor.u32 %v2009_v57, %v1467_v56  ;;  %v1443_v63 = vld [vmem:[#allocation8 + $0x40] sm:$0xf] }
  0x24   :  { %v2004_v0 = vld [vmem:[#allocation8 + $0x4c] sm:$0xf0]  ;;  %v2002_v1 = vld [vmem:[#allocation8 + $0x44] sm:$0xf]  ;;  %v1472_v2 = vor.u32 %v2007_v58, %v1469_v59  ;;  %v1445_v3 = vld [vmem:[#allocation8 + $0x50] sm:$0xf0] }
  0x25   :  { %v1451_v4 = vld [vmem:[#allocation8 + $0x48] sm:$0xf]  ;;  %v2005_v5 = vld [vmem:[#allocation8 + $0x54] sm:$0xf0]  ;;  %v2003_v6 = vld [vmem:[#allocation8 + $0x4c] sm:$0xf]  ;;  %v1444_v9 = vor.u32 %v2004_v0, %v1443_v63  ;;  %v1448_v10 = vor.u32 %v2002_v1, %v1445_v3 }
  0x26   :  { %406 = vmatpush.bf16.msrb.mxu0 %v1504_v42  ;;  %368 = vmatpush.bf16.msra.mxu1 %v1476_v48  ;;  %v1453_v7 = vld [vmem:[#allocation8 + $0x58] sm:$0xf0]  ;;  %v1452_v11 = vor.u32 %v2005_v5, %v1451_v4  ;;  %v1427_v12 = vld [vmem:[#allocation8 + $0x20] sm:$0xf]  ;;  %v2000_v13 = vld [vmem:[#allocation8 + $0x2c] sm:$0xf0] }
  0x27   :  { %381 = vmatpush.bf16.msra.mxu2 %v1480_v49  ;;  %394 = vmatpush.bf16.msra.mxu3 %v1484_v50  ;;  %v1998_v14 = vld [vmem:[#allocation8 + $0x24] sm:$0xf]  ;;  %v1456_v15 = vor.u32 %v2003_v6, %v1453_v7  ;;  %v1429_v16 = vld [vmem:[#allocation8 + $0x30] sm:$0xf0]  ;;  %v1435_v17 = vld [vmem:[#allocation8 + $0x28] sm:$0xf]  ;;  %v1428_v22 = vor.u32 %v2000_v13, %v1427_v12 }
  0x28   :  { %v2001_v18 = vld [vmem:[#allocation8 + $0x34] sm:$0xf0]  ;;  %v1999_v19 = vld [vmem:[#allocation8 + $0x2c] sm:$0xf]  ;;  %v1437_v20 = vld [vmem:[#allocation8 + $0x38] sm:$0xf0]  ;;  %v1432_v24 = vor.u32 %v1998_v14, %v1429_v16 }
  0x29   :  { %v97_v21 = vand.u32 127, %v96_v8  ;;  %v1411_v23 = vld [vmem:[#allocation8] sm:$0xf]  ;;  %v1436_v25 = vor.u32 %v2001_v18, %v1435_v17  ;;  %v1996_v26 = vld [vmem:[#allocation8 + $0xc] sm:$0xf0]  ;;  %v1440_v29 = vor.u32 %v1999_v19, %v1437_v20  ;;  %v2307_v45 = vmov 0.0  }
  0x2a   :  { %407 = vmatpush.bf16.msrb.mxu0 %v1488_v54  ;;  %369 = vmatpush.bf16.msra.mxu1 %v1460_v60  ;;  %v1994_v27 = vld [vmem:[#allocation8 + $0x4] sm:$0xf]  ;;  %v1413_v28 = vld [vmem:[#allocation8 + $0x10] sm:$0xf0]  ;;  %v1419_v30 = vld [vmem:[#allocation8 + $0x8] sm:$0xf]  ;;  %v1412_v37 = vor.u32 %v1996_v26, %v1411_v23 }
  0x2b   :  { %382 = vmatpush.bf16.msra.mxu2 %v1464_v61  ;;  %395 = vmatpush.bf16.msra.mxu3 %v1468_v62  ;;  %v1997_v31 = vld [vmem:[#allocation8 + $0x14] sm:$0xf0]  ;;  %v1995_v32 = vld [vmem:[#allocation8 + $0xc] sm:$0xf]  ;;  %v1421_v33 = vld [vmem:[#allocation8 + $0x18] sm:$0xf0]  ;;  %v1416_v41 = vor.u32 %v1994_v27, %v1413_v28 }
  0x2c   :  { %v1651_v34 = vld [vmem:[#allocation7 + $0xe0] sm:$0xf]  ;;  %v1992_v35 = vld [vmem:[#allocation7 + $0xec] sm:$0xf0]  ;;  %v1990_v38 = vld [vmem:[#allocation7 + $0xe4] sm:$0xf]  ;;  %v1420_v47 = vor.u32 %v1997_v31, %v1419_v30  ;;  %v1424_v48 = vor.u32 %v1995_v32, %v1421_v33 }
  0x2d   :  { %v1653_v39 = vld [vmem:[#allocation7 + $0xf0] sm:$0xf0]  ;;  %v1659_v40 = vld [vmem:[#allocation7 + $0xe8] sm:$0xf]  ;;  %v1993_v42 = vld [vmem:[#allocation7 + $0xf4] sm:$0xf0]  ;;  %v1652_v51 = vor.u32 %v1992_v35, %v1651_v34 }
  0x2e   :  { %408 = vmatpush.bf16.msrb.mxu0 %v1472_v2  ;;  %370 = vmatpush.bf16.msra.mxu1 %v1444_v9  ;;  %v1991_v43 = vld [vmem:[#allocation7 + $0xec] sm:$0xf]  ;;  %v1661_v44 = vld [vmem:[#allocation7 + $0xf8] sm:$0xf0]  ;;  %v138_v49 = vld [vmem:[#allocation5] sm:$0xff]  ;;  %v1656_v52 = vor.u32 %v1990_v38, %v1653_v39  ;;  %v1660_v55 = vor.u32 %v1993_v42, %v1659_v40  ;;  %s2309_s10 = smov [#allocation10]  }
  0x2f   :  { %383 = vmatpush.bf16.msra.mxu2 %v1448_v10  ;;  %396 = vmatpush.bf16.msra.mxu3 %v1452_v11  ;;  %v1635_v53 = vld [vmem:[#allocation7 + $0xc0] sm:$0xf]  ;;  %v1988_v54 = vld [vmem:[#allocation7 + $0xcc] sm:$0xf0]  ;;  %v1664_v56 = vor.u32 %v1991_v43, %v1661_v44  ;;  %v1986_v57 = vld [vmem:[#allocation7 + $0xc4] sm:$0xf]  ;;  %v2376_v63 = vpack.c.bf16 %v138_v49, %v138_v49 }
  0x30   :  { %v1637_v58 = vld [vmem:[#allocation7 + $0xd0] sm:$0xf0]  ;;  %v1643_v59 = vld [vmem:[#allocation7 + $0xc8] sm:$0xf]  ;;  %v1989_v60 = vld [vmem:[#allocation7 + $0xd4] sm:$0xf0]  ;;  %v1636_v0 = vor.u32 %v1988_v54, %v1635_v53 }
  0x31   :  { %v1987_v61 = vld [vmem:[#allocation7 + $0xcc] sm:$0xf]  ;;  %v1645_v62 = vld [vmem:[#allocation7 + $0xd8] sm:$0xf0]  ;;  %v1640_v1 = vor.u32 %v1986_v57, %v1637_v58  ;;  %v1619_v2 = vld [vmem:[#allocation7 + $0xa0] sm:$0xf]  ;;  %v1644_v4 = vor.u32 %v1989_v60, %v1643_v59 }
  0x32   :  { %409 = vmatpush.bf16.msrb.mxu0 %v1456_v15  ;;  %371 = vmatpush.bf16.msra.mxu1 %v1428_v22  ;;  %v1984_v3 = vld [vmem:[#allocation7 + $0xac] sm:$0xf0]  ;;  %v1648_v5 = vor.u32 %v1987_v61, %v1645_v62  ;;  %v1982_v6 = vld [vmem:[#allocation7 + $0xa4] sm:$0xf]  ;;  %v1621_v7 = vld [vmem:[#allocation7 + $0xb0] sm:$0xf0] }
  0x33   :  { %384 = vmatpush.bf16.msra.mxu2 %v1432_v24  ;;  %397 = vmatpush.bf16.msra.mxu3 %v1436_v25  ;;  %v1627_v8 = vld [vmem:[#allocation7 + $0xa8] sm:$0xf]  ;;  %v1985_v9 = vld [vmem:[#allocation7 + $0xb4] sm:$0xf0]  ;;  %v1983_v10 = vld [vmem:[#allocation7 + $0xac] sm:$0xf]  ;;  %v1620_v12 = vor.u32 %v1984_v3, %v1619_v2  ;;  %v1624_v13 = vor.u32 %v1982_v6, %v1621_v7 }
  0x34   :  { %v1629_v11 = vld [vmem:[#allocation7 + $0xb8] sm:$0xf0]  ;;  %v1603_v14 = vld [vmem:[#allocation7 + $0x80] sm:$0xf]  ;;  %v1980_v15 = vld [vmem:[#allocation7 + $0x8c] sm:$0xf0]  ;;  %v1628_v16 = vor.u32 %v1985_v9, %v1627_v8 }
  0x35   :  { %v1632_v17 = vor.u32 %v1983_v10, %v1629_v11  ;;  %v1978_v18 = vld [vmem:[#allocation7 + $0x84] sm:$0xf]  ;;  %v1605_v19 = vld [vmem:[#allocation7 + $0x90] sm:$0xf0]  ;;  %v1611_v20 = vld [vmem:[#allocation7 + $0x88] sm:$0xf]  ;;  %v1604_v24 = vor.u32 %v1980_v15, %v1603_v14 }
  0x36   :  { %410 = vmatpush.bf16.msrb.mxu0 %v1440_v29  ;;  %372 = vmatpush.bf16.msra.mxu1 %v1412_v37  ;;  %v1979_v22 = vld [vmem:[#allocation7 + $0x8c] sm:$0xf]  ;;  %v1613_v23 = vld [vmem:[#allocation7 + $0x98] sm:$0xf0]  ;;  %v1608_v25 = vor.u32 %v1978_v18, %v1605_v19  ;;  %v1587_v26 = vld [vmem:[#allocation7 + $0x60] sm:$0xf] }
  0x37   :  { %385 = vmatpush.bf16.msra.mxu2 %v1416_v41  ;;  %398 = vmatpush.bf16.msra.mxu3 %v1420_v47  ;;  %v1976_v27 = vld [vmem:[#allocation7 + $0x6c] sm:$0xf0]  ;;  %v1616_v29 = vor.u32 %v1979_v22, %v1613_v23  ;;  %v1974_v30 = vld [vmem:[#allocation7 + $0x64] sm:$0xf]  ;;  %v1589_v31 = vld [vmem:[#allocation7 + $0x70] sm:$0xf0] }
  0x38   :  { %v1595_v32 = vld [vmem:[#allocation7 + $0x68] sm:$0xf]  ;;  %v1977_v33 = vld [vmem:[#allocation7 + $0x74] sm:$0xf0]  ;;  %v1975_v34 = vld [vmem:[#allocation7 + $0x6c] sm:$0xf]  ;;  %v1592_v37 = vor.u32 %v1974_v30, %v1589_v31 }
  0x39   :  { %373 = vmatmul.bf16.vlgmr.msra.gmra.mxu1 %v2376_v63  ;;  %v1597_v35 = vld [vmem:[#allocation7 + $0x78] sm:$0xf0]  ;;  %v1571_v38 = vld [vmem:[#allocation7 + $0x40] sm:$0xf]  ;;  %v1972_v39 = vld [vmem:[#allocation7 + $0x4c] sm:$0xf0]  ;;  %v1596_v40 = vor.u32 %v1977_v33, %v1595_v32 }
  0x3a   :  { %411 = vmatpush.bf16.msrb.mxu0 %v1424_v48  ;;  %577 = vmatpush.bf16.msrb.mxu1 %v1652_v51  ;;  %v1600_v41 = vor.u32 %v1975_v34, %v1597_v35  ;;  %v1970_v42 = vld [vmem:[#allocation7 + $0x44] sm:$0xf]  ;;  %v1573_v43 = vld [vmem:[#allocation7 + $0x50] sm:$0xf0]  ;;  %v1579_v44 = vld [vmem:[#allocation7 + $0x48] sm:$0xf]  ;;  %v1572_v48 = vor.u32 %v1972_v39, %v1571_v38 }
  0x3b   :  { %590 = vmatpush.bf16.msrb.mxu2 %v1656_v52  ;;  %603 = vmatpush.bf16.msrb.mxu3 %v1660_v55  ;;  %v1581_v47 = vld [vmem:[#allocation7 + $0x58] sm:$0xf0]  ;;  %v1576_v49 = vor.u32 %v1970_v42, %v1573_v43  ;;  %v1968_v51 = vld [vmem:[#allocation7 + $0x2c] sm:$0xf0]  ;;  %v1966_v54 = vld [vmem:[#allocation7 + $0x24] sm:$0xf] }
  0x3c   :  { %386 = vmatmul.bf16.vlgmr.msra.gmra.mxu2 %v2376_v63  ;;  %399 = vmatmul.bf16.vlgmr.msra.gmra.mxu3 %v2376_v63  ;;  %v1557_v55 = vld [vmem:[#allocation7 + $0x30] sm:$0xf0]  ;;  %v1969_v57 = vld [vmem:[#allocation7 + $0x34] sm:$0xf0]  ;;  %v1967_v58 = vld [vmem:[#allocation7 + $0x2c] sm:$0xf] }
  0x3d   :  { %v1565_v59 = vld [vmem:[#allocation7 + $0x38] sm:$0xf0]  ;;  %v1560_v61 = vor.u32 %v1966_v54, %v1557_v55  ;;  %v1962_v2 = vld [vmem:[#allocation7 + $0x4] sm:$0xf]  ;;  %v1965_v6 = vld [vmem:[#allocation7 + $0x14] sm:$0xf0] }
  0x3e   :  { %578 = vmatpush.bf16.msrb.mxu1 %v1636_v0  ;;  %v1539_v0 = vld [vmem:[#allocation7] sm:$0xf]  ;;  %v1963_v9 = vld [vmem:[#allocation7 + $0xc] sm:$0xf]  ;;  %v1549_v10 = vld [vmem:[#allocation7 + $0x18] sm:$0xf0] }
  0x3f   :  { %591 = vmatpush.bf16.msrb.mxu2 %v1640_v1  ;;  %604 = vmatpush.bf16.msrb.mxu3 %v1644_v4  ;;  %v1964_v1 = vld [vmem:[#allocation7 + $0xc] sm:$0xf0]  ;;  %v1541_v4 = vld [vmem:[#allocation7 + $0x10] sm:$0xf0]  ;;  %v1552_v11 = vor.u32 %v1963_v9, %v1549_v10  ;;  %v2086_v14 = vld [vmem:[#allocation8 + $0x1e4] sm:$0xf] }
  0x40   :  { %v1540_v3 = vor.u32 %v1964_v1, %v1539_v0  ;;  %v1544_v7 = vor.u32 %v1962_v2, %v1541_v4  ;;  %v2089_v18 = vld [vmem:[#allocation8 + $0x1f4] sm:$0xf0]  ;;  %v1792_v22 = vld [vmem:[#allocation8 + $0x1f8] sm:$0xf0]  ;;  %v1766_v23 = vld [vmem:[#allocation8 + $0x1c0] sm:$0xf] }
  0x41   :  { %v1774_v30 = vld [vmem:[#allocation8 + $0x1c8] sm:$0xf]  ;;  %v2085_v31 = vld [vmem:[#allocation8 + $0x1d4] sm:$0xf0]  ;;  %v2083_v32 = vld [vmem:[#allocation8 + $0x1cc] sm:$0xf] }
  0x42   :  { %579 = vmatpush.bf16.msrb.mxu1 %v1620_v12  ;;  %v1782_v12 = vld [vmem:[#allocation8 + $0x1e0] sm:$0xf]  ;;  %v1775_v33 = vor.u32 %v2085_v31, %v1774_v30  ;;  %v1776_v34 = vld [vmem:[#allocation8 + $0x1d8] sm:$0xf0]  ;;  %v2081_v54 = vld [vmem:[#allocation8 + $0x1b4] sm:$0xf0] }
  0x43   :  { %592 = vmatpush.bf16.msrb.mxu2 %v1624_v13  ;;  %605 = vmatpush.bf16.msrb.mxu3 %v1628_v16  ;;  %v2088_v13 = vld [vmem:[#allocation8 + $0x1ec] sm:$0xf0]  ;;  %v1784_v16 = vld [vmem:[#allocation8 + $0x1f0] sm:$0xf0]  ;;  %v1779_v35 = vor.u32 %v2083_v32, %v1776_v34  ;;  %v2079_v55 = vld [vmem:[#allocation8 + $0x1ac] sm:$0xf] }
  0x44   :  { %v1783_v15 = vor.u32 %v2088_v13, %v1782_v12  ;;  %v1787_v19 = vor.u32 %v2086_v14, %v1784_v16  ;;  %v1742_v0 = vld [vmem:[#allocation8 + $0x188] sm:$0xf]  ;;  %v2077_v1 = vld [vmem:[#allocation8 + $0x194] sm:$0xf0]  ;;  %v2075_v4 = vld [vmem:[#allocation8 + $0x18c] sm:$0xf] }
  0x45   :  { %v2070_v10 = vld [vmem:[#allocation8 + $0x164] sm:$0xf]  ;;  %v1726_v12 = vld [vmem:[#allocation8 + $0x168] sm:$0xf]  ;;  %v2073_v14 = vld [vmem:[#allocation8 + $0x174] sm:$0xf0] }
  0x46   :  { %580 = vmatpush.bf16.msrb.mxu1 %v1604_v24  ;;  %v1728_v16 = vld [vmem:[#allocation8 + $0x178] sm:$0xf0]  ;;  %v1686_v31 = vld [vmem:[#allocation8 + $0x120] sm:$0xf]  ;;  %v2064_v32 = vld [vmem:[#allocation8 + $0x12c] sm:$0xf0] }
  0x47   :  { %593 = vmatpush.bf16.msrb.mxu2 %v1608_v25  ;;  %v2084_v25 = vld [vmem:[#allocation8 + $0x1cc] sm:$0xf0]  ;;  %v1687_v34 = vor.u32 %v2064_v32, %v1686_v31  ;;  %v2047_v32 = vld [vmem:[#allocation7 + $0x1ac] sm:$0xf]  ;;  %s1370_s0 = sshll.u32 %s2309_s10, 4  ;;  %s1372_s12 = sshll.u32 %s2457_s8, 4  ;;  %s1371_s0 = int_to_ptr.vmem [resolvable:$true] %s1370_s0  ;;  %s1373_s12 = int_to_ptr.hbm [resolvable:$true] %s1372_s12 }
  0x4b   :  { %594 = vmatpush.bf16.msrb.mxu2 %v1592_v37 }
  0x4f   :  { %595 = vmatpush.bf16.msrb.mxu2 %v1576_v49  ;;  %v2078_v49 = vld [vmem:[#allocation8 + $0x1a4] sm:$0xf] }
  0x53   :  { %596 = vmatpush.bf16.msrb.mxu2 %v1560_v61  ;;  %v2074_v61 = vld [vmem:[#allocation8 + $0x184] sm:$0xf] }
  0x57   :  { %597 = vmatpush.bf16.msrb.mxu2 %v1544_v7  ;;  %v1718_v7 = vld [vmem:[#allocation8 + $0x160] sm:$0xf] }
  0x5b   :  { %951 = vmatpush.bf16.msra.mxu2 %v1787_v19  ;;  %v1702_v19 = vld [vmem:[#allocation8 + $0x140] sm:$0xf] }
  0x89   :  { %v100_v36 = vpop.permute.xlu0 %99 }
  0x8a   :  { %vm101_vm0 = vcmp.eq.s32.totalorder %v100_v36, %v97_v21  ;;  %v1981_v21 = vld [vmem:[#allocation7 + $0x94] sm:$0xf0]  ;;  %v1588_v36 = vor.u32 %v1976_v27, %v1587_v26  ;;  %v2082_v26 = vld [vmem:[#allocation8 + $0x1c4] sm:$0xf]  ;;  %v1768_v27 = vld [vmem:[#allocation8 + $0x1d0] sm:$0xf0] }
  0x8b   :  { %v102_v46 = vsel %vm101_vm0, 1.0, %v2307_v45  ;;  %v1612_v28 = vor.u32 %v1981_v21, %v1611_v20  ;;  %v1973_v45 = vld [vmem:[#allocation7 + $0x54] sm:$0xf0]  ;;  %v2087_v21 = vld [vmem:[#allocation8 + $0x1ec] sm:$0xf] }
  0x8c   :  { %v103_v50 = vpack.c.bf16 %v102_v46, %v102_v46  ;;  %v1971_v46 = vld [vmem:[#allocation7 + $0x4c] sm:$0xf]  ;;  %581 = vmatpush.bf16.msrb.mxu1 %v1588_v36  ;;  %v1580_v52 = vor.u32 %v1973_v45, %v1579_v44  ;;  %v1795_v24 = vor.u32 %v2087_v21, %v1792_v22  ;;  %v2066_v21 = vld [vmem:[#allocation8 + $0x144] sm:$0xf] }
  0x8d   :  { %606 = vmatpush.bf16.msrb.mxu3 %v1612_v28  ;;  %v1584_v53 = vor.u32 %v1971_v46, %v1581_v47  ;;  %v1767_v28 = vor.u32 %v2084_v25, %v1766_v23  ;;  %v1750_v47 = vld [vmem:[#allocation8 + $0x1a0] sm:$0xf]  ;;  %v1704_v23 = vld [vmem:[#allocation8 + $0x150] sm:$0xf0]  ;;  %v2069_v25 = vld [vmem:[#allocation8 + $0x154] sm:$0xf0] }
  0x8e   :  { %1408 = vmatmul.msk.bf16.vlgmr.msra.gmra.mxu0 %vm120_vm1, %v103_v50  ;;  %v1555_v50 = vld [vmem:[#allocation7 + $0x20] sm:$0xf] }
  0x8f   :  { %616 = vmatpush.bf16.msra.mxu0 %v1664_v56  ;;  %v1563_v56 = vld [vmem:[#allocation7 + $0x28] sm:$0xf]  ;;  %v1556_v60 = vor.u32 %v1968_v51, %v1555_v50  ;;  %v1752_v51 = vld [vmem:[#allocation8 + $0x1b0] sm:$0xf0] }
  0x90   :  { %582 = vmatpush.bf16.msrb.mxu1 %v1572_v48  ;;  %v1564_v62 = vor.u32 %v1969_v57, %v1563_v56  ;;  %v2080_v48 = vld [vmem:[#allocation8 + $0x1ac] sm:$0xf0]  ;;  %v1760_v57 = vld [vmem:[#allocation8 + $0x1b8] sm:$0xf0] }
  0x91   :  { %607 = vmatpush.bf16.msrb.mxu3 %v1596_v40  ;;  %v1751_v50 = vor.u32 %v2080_v48, %v1750_v47  ;;  %v1670_v47 = vld [vmem:[#allocation8 + $0x100] sm:$0xf]  ;;  %v2060_v48 = vld [vmem:[#allocation8 + $0x10c] sm:$0xf0] }
  0x93   :  { %617 = vmatpush.bf16.msra.mxu0 %v1648_v5  ;;  %v1547_v5 = vld [vmem:[#allocation7 + $0x8] sm:$0xf] }
  0x94   :  { %583 = vmatpush.bf16.msrb.mxu1 %v1556_v60  ;;  %v1548_v8 = vor.u32 %v1965_v6, %v1547_v5  ;;  %v2076_v60 = vld [vmem:[#allocation8 + $0x18c] sm:$0xf0]  ;;  %v1744_v5 = vld [vmem:[#allocation8 + $0x198] sm:$0xf0] }
  0x95   :  { %608 = vmatpush.bf16.msrb.mxu3 %v1580_v52  ;;  %v1758_v52 = vld [vmem:[#allocation8 + $0x1a8] sm:$0xf]  ;;  %v1747_v6 = vor.u32 %v2075_v4, %v1744_v5  ;;  %v1920_v5 = vld [vmem:[#allocation7 + $0x1f8] sm:$0xf0] }
  0x96   :  { %v1759_v56 = vor.u32 %v2081_v54, %v1758_v52  ;;  %v1678_v52 = vld [vmem:[#allocation8 + $0x108] sm:$0xf] }
  0x97   :  { %618 = vmatpush.bf16.msra.mxu0 %v1632_v17  ;;  %v1790_v17 = vld [vmem:[#allocation8 + $0x1e8] sm:$0xf] }
  0x98   :  { %584 = vmatpush.bf16.msrb.mxu1 %v1540_v3  ;;  %v1791_v20 = vor.u32 %v2089_v18, %v1790_v17  ;;  %v1743_v3 = vor.u32 %v2077_v1, %v1742_v0  ;;  %v1727_v17 = vor.u32 %v2073_v14, %v1726_v12  ;;  %v1918_v1 = vld [vmem:[#allocation7 + $0x1e8] sm:$0xf]  ;;  %v2053_v14 = vld [vmem:[#allocation7 + $0x1d4] sm:$0xf0] }
  0x99   :  { %609 = vmatpush.bf16.msrb.mxu3 %v1564_v62  ;;  %v1902_v12 = vld [vmem:[#allocation7 + $0x1c8] sm:$0xf] }
  0x9b   :  { %619 = vmatpush.bf16.msra.mxu0 %v1616_v29  ;;  %v1771_v29 = vor.u32 %v2082_v26, %v1768_v27  ;;  %v1707_v26 = vor.u32 %v2066_v21, %v1704_v23  ;;  %v2048_v23 = vld [vmem:[#allocation7 + $0x1ac] sm:$0xf0] }
  0x9c   :  { %938 = vmatpush.bf16.msra.mxu1 %v1783_v15  ;;  %v2071_v15 = vld [vmem:[#allocation8 + $0x16c] sm:$0xf] }
  0x9d   :  { %610 = vmatpush.bf16.msrb.mxu3 %v1548_v8  ;;  %952 = vmatpush.bf16.msra.mxu2 %v1771_v29  ;;  %v2072_v8 = vld [vmem:[#allocation8 + $0x16c] sm:$0xf0]  ;;  %v1731_v18 = vor.u32 %v2071_v15, %v1728_v16  ;;  %v1712_v29 = vld [vmem:[#allocation8 + $0x158] sm:$0xf0]  ;;  %v2051_v15 = vld [vmem:[#allocation7 + $0x1cc] sm:$0xf] }
  0x9e   :  { %412 = vmatmul.bf16.vlgmr.msrb.gmra.mxu0 %v2376_v63  ;;  %v1568_v63 = vor.u32 %v1967_v58, %v1565_v59  ;;  %v1763_v58 = vor.u32 %v2079_v55, %v1760_v57  ;;  %v1734_v59 = vld [vmem:[#allocation8 + $0x180] sm:$0xf]  ;;  %v1719_v9 = vor.u32 %v2072_v8, %v1718_v7  ;;  %v1680_v57 = vld [vmem:[#allocation8 + $0x118] sm:$0xf0]  ;;  %v2052_v7 = vld [vmem:[#allocation7 + $0x1cc] sm:$0xf0] }
  0x9f   :  { %620 = vmatpush.bf16.msra.mxu0 %v1600_v41  ;;  %v1735_v62 = vor.u32 %v2076_v60, %v1734_v59  ;;  %v2056_v60 = vld [vmem:[#allocation7 + $0x1ec] sm:$0xf0]  ;;  %v1904_v16 = vld [vmem:[#allocation7 + $0x1d8] sm:$0xf0] }
  0xa0   :  { %939 = vmatpush.bf16.msra.mxu1 %v1767_v28  ;;  %v2067_v28 = vld [vmem:[#allocation8 + $0x14c] sm:$0xf] }
  0xa1   :  { %964 = vmatpush.bf16.msra.mxu3 %v1791_v20  ;;  %v2068_v20 = vld [vmem:[#allocation8 + $0x14c] sm:$0xf0]  ;;  %v1715_v30 = vor.u32 %v2067_v28, %v1712_v29  ;;  %v2049_v28 = vld [vmem:[#allocation7 + $0x1b4] sm:$0xf0] }
  0xa2   :  { %v1703_v22 = vor.u32 %v2068_v20, %v1702_v19  ;;  %v1907_v19 = vor.u32 %v2051_v15, %v1904_v16  ;;  %v709_v20 = vld [vmem:[#allocation5 + $0x8] sm:$0xff]  ;;  %v1832_v15 = vld [vmem:[#allocation7 + $0x150] sm:$0xf0]  ;;  %v2037_v16 = vld [vmem:[#allocation7 + $0x154] sm:$0xf0] }
  0xa3   :  { %621 = vmatpush.bf16.msra.mxu0 %v1584_v53  ;;  %v1755_v53 = vor.u32 %v2078_v49, %v1752_v51  ;;  %v2058_v49 = vld [vmem:[#allocation8 + $0x104] sm:$0xf]  ;;  %v1672_v51 = vld [vmem:[#allocation8 + $0x110] sm:$0xf0]  ;;  %v744_v21 = vpack.c.bf16 %v709_v20, %v709_v20  ;;  %v2035_v20 = vld [vmem:[#allocation7 + $0x14c] sm:$0xf] }
  0xa4   :  { %940 = vmatpush.bf16.msra.mxu1 %v1751_v50  ;;  %v1671_v50 = vor.u32 %v2060_v48, %v1670_v47  ;;  %v1675_v54 = vor.u32 %v2058_v49, %v1672_v51  ;;  %v1870_v47 = vld [vmem:[#allocation7 + $0x188] sm:$0xf]  ;;  %v2045_v48 = vld [vmem:[#allocation7 + $0x194] sm:$0xf0] }
  0xa5   :  { %965 = vmatpush.bf16.msra.mxu3 %v1775_v33  ;;  %953 = vmatpush.bf16.msra.mxu2 %v1755_v53  ;;  %v2062_v33 = vld [vmem:[#allocation8 + $0x124] sm:$0xf]  ;;  %v2061_v53 = vld [vmem:[#allocation8 + $0x114] sm:$0xf0]  ;;  %v1871_v51 = vor.u32 %v2045_v48, %v1870_v47  ;;  %v2028_v47 = vld [vmem:[#allocation7 + $0x10c] sm:$0xf0] }
  0xa6   :  { %v1679_v55 = vor.u32 %v2061_v53, %v1678_v52  ;;  %v2043_v52 = vld [vmem:[#allocation7 + $0x18c] sm:$0xf]  ;;  %v2026_v48 = vld [vmem:[#allocation7 + $0x104] sm:$0xf] }
  0xa7   :  { %622 = vmatpush.bf16.msra.mxu0 %v1568_v63  ;;  %v1736_v63 = vld [vmem:[#allocation8 + $0x190] sm:$0xf0] }
  0xa8   :  { %v1739_v2 = vor.u32 %v2074_v61, %v1736_v63  ;;  %941 = vmatpush.bf16.msra.mxu1 %v1735_v62  ;;  %v2054_v61 = vld [vmem:[#allocation7 + $0x1e4] sm:$0xf]  ;;  %v1912_v62 = vld [vmem:[#allocation7 + $0x1f0] sm:$0xf0] }
  0xa9   :  { %966 = vmatpush.bf16.msra.mxu3 %v1759_v56  ;;  %v2059_v56 = vld [vmem:[#allocation8 + $0x10c] sm:$0xf]  ;;  %v1915_v0 = vor.u32 %v2054_v61, %v1912_v62  ;;  %v2038_v61 = vld [vmem:[#allocation7 + $0x164] sm:$0xf]  ;;  %v1848_v62 = vld [vmem:[#allocation7 + $0x170] sm:$0xf0] }
  0xaa   :  { %954 = vmatpush.bf16.msra.mxu2 %v1739_v2  ;;  %v1683_v59 = vor.u32 %v2059_v56, %v1680_v57  ;;  %v2057_v2 = vld [vmem:[#allocation7 + $0x1f4] sm:$0xf0]  ;;  %v1846_v57 = vld [vmem:[#allocation7 + $0x160] sm:$0xf] }
  0xab   :  { %623 = vmatpush.bf16.msra.mxu0 %v1552_v11  ;;  %v1720_v11 = vld [vmem:[#allocation8 + $0x170] sm:$0xf0]  ;;  %v1919_v4 = vor.u32 %v2057_v2, %v1918_v1  ;;  %v1851_v2 = vor.u32 %v2038_v61, %v1848_v62 }
  0xac   :  { %v1723_v13 = vor.u32 %v2070_v10, %v1720_v11  ;;  %942 = vmatpush.bf16.msra.mxu1 %v1719_v9  ;;  %v2050_v10 = vld [vmem:[#allocation7 + $0x1c4] sm:$0xf]  ;;  %v1896_v11 = vld [vmem:[#allocation7 + $0x1d0] sm:$0xf0] }
  0xad   :  { %967 = vmatpush.bf16.msra.mxu3 %v1743_v3  ;;  %v2055_v3 = vld [vmem:[#allocation7 + $0x1ec] sm:$0xf] }
  0xae   :  { %955 = vmatpush.bf16.msra.mxu2 %v1723_v13  ;;  %v1923_v8 = vor.u32 %v2055_v3, %v1920_v5  ;;  %v1899_v13 = vor.u32 %v2050_v10, %v1896_v11  ;;  %v2041_v3 = vld [vmem:[#allocation7 + $0x174] sm:$0xf0]  ;;  %v1856_v5 = vld [vmem:[#allocation7 + $0x178] sm:$0xf0]  ;;  %v1830_v10 = vld [vmem:[#allocation7 + $0x140] sm:$0xf] }
  0xaf   :  { %977 = vmatpush.bf16.msrb.mxu0 %v1795_v24  ;;  %v1710_v24 = vld [vmem:[#allocation8 + $0x148] sm:$0xf]  ;;  %v2036_v11 = vld [vmem:[#allocation7 + $0x14c] sm:$0xf0] }
  0xb0   :  { %v1711_v27 = vor.u32 %v2069_v25, %v1710_v24  ;;  %943 = vmatpush.bf16.msra.mxu1 %v1703_v22  ;;  %v1878_v22 = vld [vmem:[#allocation7 + $0x1a0] sm:$0xf]  ;;  %v2046_v24 = vld [vmem:[#allocation7 + $0x1a4] sm:$0xf] }
  0xb1   :  { %968 = vmatpush.bf16.msra.mxu3 %v1727_v17  ;;  %v2393_v17 = vld [vmem:[%s2454_s5] sm:$0xf]  ;;  %v1879_v25 = vor.u32 %v2048_v23, %v1878_v22  ;;  %v1814_v22 = vld [vmem:[#allocation7 + $0x120] sm:$0xf] }
  0xb2   :  { %956 = vmatpush.bf16.msra.mxu2 %v1707_v26  ;;  %v1880_v26 = vld [vmem:[#allocation7 + $0x1b0] sm:$0xf0]  ;;  %v631_v29 = vperm.slane %v2393_v17, 0  ;;  %v632_v53 = vperm.slane %v2393_v17, 1 }
  0xb3   :  { %978 = vmatpush.bf16.msrb.mxu0 %v1779_v35  ;;  %v1688_v35 = vld [vmem:[#allocation8 + $0x130] sm:$0xf0] }
  0xb4   :  { %944 = vmatpush.bf16.msra.mxu1 %v1687_v34 }
  0xb5   :  { %969 = vmatpush.bf16.msra.mxu3 %v1711_v27  ;;  %v1886_v27 = vld [vmem:[#allocation7 + $0x1a8] sm:$0xf] }
  0xb6   :  { %v2382_v38 = vpop.f32.mrf.mxu1  ;;  %v1887_v31 = vor.u32 %v2049_v28, %v1886_v27 }
  0xb7   :  { %979 = vmatpush.bf16.msrb.mxu0 %v1763_v58  ;;  %v1910_v58 = vld [vmem:[#allocation7 + $0x1e0] sm:$0xf] }
  0xb8   :  { %945 = vmatpush.bf16.msra.mxu1 %v1671_v50  ;;  %v1911_v63 = vor.u32 %v2056_v60, %v1910_v58  ;;  %v2040_v58 = vld [vmem:[#allocation7 + $0x16c] sm:$0xf0] }
  0xb9   :  { %v1847_v60 = vor.u32 %v2040_v58, %v1846_v57 }
  0xbb   :  { %980 = vmatpush.bf16.msrb.mxu0 %v1747_v6  ;;  %v1894_v6 = vld [vmem:[#allocation7 + $0x1c0] sm:$0xf] }
  0xbc   :  { %v1895_v9 = vor.u32 %v2052_v7, %v1894_v6 }
  0xbe   :  { %v376_v42 = vpop.f32.mrf.mxu1 }
  0xbf   :  { %v2384_v40 = vpop.f32.mrf.mxu2  ;;  %v2386_v41 = vpop.f32.mrf.mxu3  ;;  %981 = vmatpush.bf16.msrb.mxu0 %v1731_v18  ;;  %v1903_v18 = vor.u32 %v2053_v14, %v1902_v12  ;;  %v2034_v12 = vld [vmem:[#allocation7 + $0x144] sm:$0xf] }
  0xc3   :  { %982 = vmatpush.bf16.msrb.mxu0 %v1715_v30  ;;  %v1883_v30 = vor.u32 %v2046_v24, %v1880_v26  ;;  %v2030_v26 = vld [vmem:[#allocation7 + $0x124] sm:$0xf] }
  0xc7   :  { %v389_v44 = vpop.f32.mrf.mxu2  ;;  %v402_v45 = vpop.f32.mrf.mxu3 }
  0xc8   :  { %v2063_v44 = vld [vmem:[#allocation8 + $0x12c] sm:$0xf]  ;;  %v1696_v45 = vld [vmem:[#allocation8 + $0x138] sm:$0xf0] }
 0x10b   :  { %v133_v36 = vpop.f32.mrf.mxu0 }
 0x10c   :  { %v137_v37 = vpack.c.bf16 %v133_v36, %v133_v36  ;;  %v1694_v36 = vld [vmem:[#allocation8 + $0x128] sm:$0xf] }
 0x10e   :  { %585 = vmatmul.bf16.vlgmr.msrb.gmra.mxu1 %v137_v37  ;;  %598 = vmatmul.bf16.vlgmr.msrb.gmra.mxu2 %v137_v37 }
 0x10f   :  { %611 = vmatmul.bf16.vlgmr.msrb.gmra.mxu3 %v137_v37  ;;  %624 = vmatmul.bf16.vlgmr.msra.gmra.mxu0 %v137_v37  ;;  %v2065_v37 = vld [vmem:[#allocation8 + $0x134] sm:$0xf0] }
 0x110   :  { %v1695_v42 = vor.u32 %v2065_v37, %v1694_v36  ;;  %1150 = vmatpush.bf16.msrb.mxu1 %v1911_v63  ;;  %v1854_v63 = vld [vmem:[#allocation7 + $0x168] sm:$0xf] }
 0x112   :  { %970 = vmatpush.bf16.msra.mxu3 %v1695_v42  ;;  %v2044_v42 = vld [vmem:[#allocation7 + $0x18c] sm:$0xf0] }
 0x113   :  { %v135_v39 = vpop.f32.mrf.mxu0 }
 0x114   :  { %v1691_v39 = vor.u32 %v2062_v33, %v1688_v35  ;;  %1151 = vmatpush.bf16.msrb.mxu1 %v1895_v9  ;;  %v1888_v33 = vld [vmem:[#allocation7 + $0x1b8] sm:$0xf0] }
 0x115   :  { %v1891_v35 = vor.u32 %v2047_v32, %v1888_v33  ;;  %v2033_v32 = vld [vmem:[#allocation7 + $0x134] sm:$0xf0]  ;;  %v2031_v33 = vld [vmem:[#allocation7 + $0x12c] sm:$0xf] }
 0x116   :  { %957 = vmatpush.bf16.msra.mxu2 %v1691_v39  ;;  %971 = vmatpush.bf16.msra.mxu3 %v1679_v55  ;;  %v1862_v39 = vld [vmem:[#allocation7 + $0x180] sm:$0xf] }
 0x118   :  { %1152 = vmatpush.bf16.msrb.mxu1 %v1879_v25  ;;  %v2032_v25 = vld [vmem:[#allocation7 + $0x12c] sm:$0xf0] }
 0x11a   :  { %958 = vmatpush.bf16.msra.mxu2 %v1675_v54  ;;  %1176 = vmatpush.bf16.msrb.mxu3 %v1919_v4  ;;  %v633_v54 = vperm.slane %v2393_v17, 2  ;;  %v2039_v4 = vld [vmem:[#allocation7 + $0x16c] sm:$0xf] }
 0x11b   :  { %v2388_v43 = vpop.f32.mrf.mxu0  ;;  %v1859_v9 = vor.u32 %v2039_v4, %v1856_v5 }
 0x11e   :  { %1163 = vmatpush.bf16.msrb.mxu2 %v1915_v0  ;;  %1177 = vmatpush.bf16.msrb.mxu3 %v1903_v18 }
 0x11f   :  { %959 = vmatmul.bf16.vlgmr.msra.gmra.mxu2 %v744_v21  ;;  %946 = vmatmul.bf16.vlgmr.msra.gmra.mxu1 %v744_v21 }
 0x120   :  { %972 = vmatmul.bf16.vlgmr.msra.gmra.mxu3 %v744_v21 }
 0x122   :  { %1164 = vmatpush.bf16.msrb.mxu2 %v1899_v13  ;;  %1178 = vmatpush.bf16.msrb.mxu3 %v1887_v31 }
 0x123   :  { %v415_v46 = vpop.f32.mrf.mxu0 }
 0x124   :  { %v1699_v46 = vor.u32 %v2063_v44, %v1696_v45  ;;  %v2042_v44 = vld [vmem:[#allocation7 + $0x184] sm:$0xf]  ;;  %v1863_v45 = vor.u32 %v2044_v42, %v1862_v39  ;;  %v1815_v39 = vor.u32 %v2032_v25, %v1814_v22 }
 0x126   :  { %983 = vmatpush.bf16.msrb.mxu0 %v1699_v46  ;;  %v1864_v46 = vld [vmem:[#allocation7 + $0x190] sm:$0xf0]  ;;  %1165 = vmatpush.bf16.msrb.mxu2 %v1883_v30  ;;  %v1822_v30 = vld [vmem:[#allocation7 + $0x128] sm:$0xf] }
 0x127   :  { %v1867_v50 = vor.u32 %v2042_v44, %v1864_v46  ;;  %1153 = vmatpush.bf16.msrb.mxu1 %v1863_v45  ;;  %1179 = vmatpush.bf16.msrb.mxu3 %v1871_v51  ;;  %v1823_v45 = vor.u32 %v2033_v32, %v1822_v30  ;;  %v1798_v46 = vld [vmem:[#allocation7 + $0x100] sm:$0xf]  ;;  %v1806_v51 = vld [vmem:[#allocation7 + $0x108] sm:$0xf] }
 0x12a   :  { %984 = vmatpush.bf16.msrb.mxu0 %v1683_v59  ;;  %1166 = vmatpush.bf16.msrb.mxu2 %v1867_v50  ;;  %v1800_v50 = vld [vmem:[#allocation7 + $0x110] sm:$0xf0] }
 0x12b   :  { %1154 = vmatpush.bf16.msrb.mxu1 %v1847_v60 }
 0x12d   :  { %985 = vmatmul.bf16.vlgmr.msrb.gmra.mxu0 %v744_v21  ;;  %v1840_v21 = vld [vmem:[#allocation7 + $0x158] sm:$0xf0] }
 0x12e   :  { %1189 = vmatpush.bf16.msra.mxu0 %v1923_v8  ;;  %v1855_v8 = vor.u32 %v2041_v3, %v1854_v63  ;;  %1167 = vmatpush.bf16.msrb.mxu2 %v1851_v2  ;;  %v1843_v28 = vor.u32 %v2035_v20, %v1840_v21 }
 0x130   :  { %1180 = vmatpush.bf16.msrb.mxu3 %v1855_v8 }
 0x132   :  { %1190 = vmatpush.bf16.msra.mxu0 %v1907_v19  ;;  %v1831_v19 = vor.u32 %v2036_v11, %v1830_v10 }
 0x134   :  { %1155 = vmatpush.bf16.msrb.mxu1 %v1831_v19  ;;  %v139_v19 = vld [vmem:[#allocation5 + $0x10] sm:$0xff] }
 0x136   :  { %1191 = vmatpush.bf16.msra.mxu0 %v1891_v35 }
 0x138   :  { %1156 = vmatpush.bf16.msrb.mxu1 %v1815_v39 }
 0x18b   :  { %v586_v34 = vpop.f32.mrf.mxu1 }
 0x18c   :  { %v587_v36 = vadd.f32 %v586_v34, %v2382_v38  ;;  %v2397_v37 = vpop.f32.mrf.mxu0  ;;  %v1872_v38 = vld [vmem:[#allocation7 + $0x198] sm:$0xf0] }
 0x18d   :  { %v1875_v55 = vor.u32 %v2043_v52, %v1872_v38  ;;  %v1824_v34 = vld [vmem:[#allocation7 + $0x138] sm:$0xf0]  ;;  %v2029_v52 = vld [vmem:[#allocation7 + $0x114] sm:$0xf0]  ;;  %v2027_v38 = vld [vmem:[#allocation7 + $0x10c] sm:$0xf] }
 0x18e   :  { %v639_v49 = vadd.f32 %v631_v29, %v587_v36  ;;  %v1816_v29 = vld [vmem:[#allocation7 + $0x130] sm:$0xf0]  ;;  %v1807_v57 = vor.u32 %v2029_v52, %v1806_v51  ;;  %v2095_v52 = vld [vmem:[%s2455_s6 + $0x28] sm:$0xff] }
 0x18f   :  { %1192 = vmatpush.bf16.msra.mxu0 %v1875_v55  ;;  %v1819_v44 = vor.u32 %v2030_v26, %v1816_v29 }
 0x190   :  { %v1665_v56 = vmul.f32 -1.442695, %v639_v49  ;;  %v1827_v49 = vor.u32 %v2031_v33, %v1824_v34 }
 0x191   :  { %v599_v59 = vpop.f32.mrf.mxu2 }
 0x192   :  { %2112 = vpow2.f32 %v1665_v56  ;;  %v600_v0 = vadd.f32 %v599_v59, %v2384_v40  ;;  %v612_v1 = vpop.f32.mrf.mxu3  ;;  %v1838_v40 = vld [vmem:[#allocation7 + $0x148] sm:$0xf]  ;;  %v1803_v56 = vor.u32 %v2026_v48, %v1800_v50  ;;  %v1924_v50 = vld [vmem:[%s2454_s5 + $0x4] sm:$0xf] }
 0x193   :  { %v613_v6 = vadd.f32 %v612_v1, %v2386_v41  ;;  %v588_v7 = vpop.f32.mrf.mxu1  ;;  %v1835_v41 = vor.u32 %v2034_v12, %v1832_v15  ;;  %v1839_v24 = vor.u32 %v2037_v16, %v1838_v40  ;;  %1193 = vmatpush.bf16.msra.mxu0 %v1859_v9  ;;  %v634_v1 = vperm.slane %v2393_v17, 3  ;;  %v2097_v48 = vld [vmem:[%s2455_s6 + $0x38] sm:$0xff] }
 0x194   :  { %v640_v13 = vadd.f32 %v632_v53, %v600_v0  ;;  %v627_v14 = vpop.f32.mrf.mxu0  ;;  %v1808_v53 = vld [vmem:[#allocation7 + $0x118] sm:$0xf0]  ;;  %v626_v0 = vadd.f32 %v2397_v37, %v2388_v43  ;;  %v1205_v51 = vperm.slane %v1924_v50, 0 }
 0x195   :  { %v641_v18 = vadd.f32 %v633_v54, %v613_v6  ;;  %1168 = vmatpush.bf16.msrb.mxu2 %v1835_v41  ;;  %1181 = vmatpush.bf16.msrb.mxu3 %v1839_v24  ;;  %v1799_v54 = vor.u32 %v2028_v47, %v1798_v46  ;;  %v1811_v60 = vor.u32 %v2027_v38, %v1808_v53 }
 0x196   :  { %v1666_v23 = vmul.f32 -1.442695, %v640_v13  ;;  %v642_v5 = vadd.f32 %v634_v1, %v626_v0 }
 0x197   :  { %v1667_v27 = vmul.f32 -1.442695, %v641_v18  ;;  %1194 = vmatpush.bf16.msra.mxu0 %v1843_v28  ;;  %1157 = vmatpush.bf16.msrb.mxu1 %v1799_v54 }
 0x198   :  { %v2113_v31 = vpop.eup %2112  ;;  %2114 = vpow2.f32 %v1666_v23 }
 0x199   :  { %v2403_v35 = vadd.f32 1.0, %v2113_v31  ;;  %2116 = vpow2.f32 %v1667_v27  ;;  %v601_v36 = vpop.f32.mrf.mxu2  ;;  %1169 = vmatpush.bf16.msrb.mxu2 %v1819_v44  ;;  %1182 = vmatpush.bf16.msrb.mxu3 %v1823_v45 }
 0x19a   :  { %v614_v42 = vpop.f32.mrf.mxu3 }
 0x19b   :  { %2118 = vrcp.f32 %v2403_v35  ;;  %1195 = vmatpush.bf16.msra.mxu0 %v1827_v49  ;;  %v666_v9 = vand.u32 2147483648, %v2403_v35  ;;  %vm660_vm3 = vweird.f32 %v2403_v35  ;;  %v664_v11 = vand.u32 2147483647, %v2403_v35  ;;  %1351 = vmatpush.bf16.msra.mxu1 %v2097_v48  ;;  %v2096_v49 = vld [vmem:[%s2455_s6 + $0x30] sm:$0xff] }
 0x19d   :  { %1170 = vmatpush.bf16.msrb.mxu2 %v1803_v56  ;;  %1183 = vmatpush.bf16.msrb.mxu3 %v1807_v57  ;;  %v667_v14 = vor.u32 1.1754944e-38, %v666_v9  ;;  %vm665_vm6 = vcmp.eq.f32.partialorder %v664_v11, 8.507059e+37  ;;  %v2094_v56 = vld [vmem:[%s2455_s6 + $0x20] sm:$0xff]  ;;  %v2091_v9 = vld [vmem:[%s2455_s6 + $0x8] sm:$0xff] }
 0x19e   :  { %v2115_v55 = vpop.eup %2114 }
 0x19f   :  { %v2117_v58 = vpop.eup %2116  ;;  %v653_v59 = vadd.f32 1.0, %v2115_v55  ;;  %1196 = vmatpush.bf16.msra.mxu0 %v1811_v60  ;;  %1352 = vmatpush.bf16.msra.mxu1 %v2096_v49  ;;  %v1207_v60 = vperm.slane %v1924_v50, 2 }
 0x1a0   :  { %v654_v61 = vadd.f32 1.0, %v2117_v58  ;;  %v1206_v58 = vperm.slane %v1924_v50, 1 }
 0x1a1   :  { %v2119_v62 = vpop.eup %2118  ;;  %2120 = vrcp.f32 %v653_v59  ;;  %v681_v43 = vand.u32 2147483648, %v653_v59  ;;  %v679_v13 = vand.u32 2147483647, %v653_v59  ;;  %vm675_vm7 = vweird.f32 %v653_v59 }
 0x1a2   :  { %v656_v63 = vmul.f32 %v2119_v62, %v2403_v35  ;;  %2122 = vrcp.f32 %v654_v61  ;;  %vm661_vm2 = vweird.f32 %v2119_v62  ;;  %v696_v27 = vand.u32 2147483648, %v654_v61  ;;  %v947_v35 = vpop.f32.mrf.mxu1  ;;  %v960_v39 = vpop.f32.mrf.mxu2 }
 0x1a3   :  { %vm662_vm4 = vmor %vm660_vm3, %vm661_vm2  ;;  %2124 = vtanh.f32 %v642_v5  ;;  %v682_v18 = vor.u32 1.1754944e-38, %v681_v43  ;;  %vm680_vm9 = vcmp.eq.f32.partialorder %v679_v13, 8.507059e+37  ;;  %vm690_vm11 = vweird.f32 %v654_v61  ;;  %v973_v42 = vpop.f32.mrf.mxu3  ;;  %1353 = vmatpush.bf16.msra.mxu1 %v2095_v52  ;;  %v2090_v43 = vld [vmem:[%s2455_s6] sm:$0xff] }
 0x1a4   :  { %v657_v2 = vsub.f32 1.0, %v656_v63  ;;  %v694_v28 = vand.u32 2147483647, %v654_v61  ;;  %v697_v30 = vor.u32 1.1754944e-38, %v696_v27 }
 0x1a6   :  { %v658_v3 = vmul.f32 %v2119_v62, %v657_v2  ;;  %vm695_vm13 = vcmp.eq.f32.partialorder %v694_v28, 8.507059e+37 }
 0x1a7   :  { %v2121_v4 = vpop.eup %2120  ;;  %1354 = vmatpush.bf16.msra.mxu1 %v2094_v56 }
 0x1a8   :  { %v2123_v6 = vpop.eup %2122  ;;  %v659_v7 = vadd.f32 %v2119_v62, %v658_v3  ;;  %v671_v8 = vmul.f32 %v2121_v4, %v653_v59  ;;  %vm676_vm5 = vweird.f32 %v2121_v4 }
 0x1a9   :  { %v686_v10 = vmul.f32 %v2123_v6, %v654_v61  ;;  %vm677_vm8 = vmor %vm675_vm7, %vm676_vm5  ;;  %v2125_v21 = vpop.eup %2124  ;;  %vm691_vm10 = vweird.f32 %v2123_v6  ;;  %v2093_v61 = vld [vmem:[%s2455_s6 + $0x18] sm:$0xff] }
 0x1aa   :  { %v672_v12 = vsub.f32 1.0, %v671_v8  ;;  %v663_v17 = vsel %vm662_vm4, %v2119_v62, %v659_v7  ;;  %vm692_vm12 = vmor %vm690_vm11, %vm691_vm10  ;;  %v986_v36 = vpop.f32.mrf.mxu0  ;;  %v949_v44 = vpop.f32.mrf.mxu1 }
 0x1ab   :  { %v687_v15 = vsub.f32 1.0, %v686_v10  ;;  %v668_v16 = vsel %vm665_vm6, %v667_v14, %v663_v17  ;;  %v962_v46 = vpop.f32.mrf.mxu2  ;;  %v975_v47 = vpop.f32.mrf.mxu3  ;;  %1355 = vmatpush.bf16.msra.mxu1 %v2093_v61 }
 0x1ac   :  { %v673_v37 = vmul.f32 %v2121_v4, %v672_v12  ;;  %v702_v41 = vmul.f32 %v2125_v21, %v668_v16 }
 0x1ad   :  { %v688_v23 = vmul.f32 %v2123_v6, %v687_v15 }
 0x1ae   :  { %v674_v40 = vadd.f32 %v2121_v4, %v673_v37 }
 0x1af   :  { %v689_v26 = vadd.f32 %v2123_v6, %v688_v23 }
 0x1b0   :  { %v678_v20 = vsel %vm677_vm8, %v2121_v4, %v674_v40  ;;  %v2092_v4 = vld [vmem:[%s2455_s6 + $0x10] sm:$0xff]  ;;  %s2308_s6 = smov [#allocation11]  }
 0x1b1   :  { %v683_v22 = vsel %vm680_vm9, %v682_v18, %v678_v20  ;;  %v693_v29 = vsel %vm692_vm12, %v2123_v6, %v689_v26  ;;  %1356 = vmatpush.bf16.msra.mxu1 %v2092_v4  ;;  %v1208_v18 = vperm.slane %v1924_v50, 3  ;;  %s1381_s1 = sshll.u32 %s2308_s6, 4  ;;  %s1382_s1 = int_to_ptr.vmem [resolvable:$true] %s1381_s1 }
 0x1b2   :  { %v701_v24 = vmul.f32 %v683_v22, %v139_v19  ;;  %v698_v32 = vsel %vm695_vm13, %v697_v30, %v693_v29  ;;  %v988_v45 = vpop.f32.mrf.mxu0 }
 0x1b4   :  { %v703_v25 = vadd.f32 %v702_v41, %v701_v24 }
 0x1b5   :  { %1357 = vmatpush.bf16.msra.mxu1 %v2091_v9 }
 0x1b6   :  { %2126 = vtanh.f32 %v703_v25  ;;  %707 = vst [vmem:[#allocation11 + $0x10] sm:$0xff] %v703_v25 }
 0x1b9   :  { %1358 = vmatpush.bf16.msra.mxu1 %v2090_v43 }
 0x1bc   :  { %v2127_v31 = vpop.eup %2126 }
 0x1bd   :  { %v705_v33 = vmul.f32 %v2127_v31, %v698_v32 }
 0x1bf   :  { %706 = vst [vmem:[#allocation11] sm:$0xff] %v705_v33  ;;  %v708_v34 = vpack.c.bf16 %v705_v33, %v705_v33 }
 0x1c1   :  { %1158 = vmatmul.bf16.vlgmr.msrb.gmra.mxu1 %v708_v34  ;;  %1171 = vmatmul.bf16.vlgmr.msrb.gmra.mxu2 %v708_v34 }
 0x1c2   :  { %1184 = vmatmul.bf16.vlgmr.msrb.gmra.mxu3 %v708_v34  ;;  %1197 = vmatmul.bf16.vlgmr.msra.gmra.mxu0 %v708_v34 }
 0x23e   :  { %v1159_v38 = vpop.f32.mrf.mxu1 }
 0x23f   :  { %v1160_v53 = vadd.f32 %v1159_v38, %v947_v35  ;;  %v1198_v54 = vpop.f32.mrf.mxu0 }
 0x240   :  { %v1199_v16 = vadd.f32 %v1198_v54, %v986_v36 }
 0x241   :  { %v1213_v55 = vadd.f32 %v1205_v51, %v1160_v53 }
 0x242   :  { %v1216_v22 = vadd.f32 %v1208_v18, %v1199_v16 }
 0x243   :  { %v1925_v57 = vmul.f32 -1.442695, %v1213_v55 }
 0x244   :  { %v1172_v59 = vpop.f32.mrf.mxu2 }
 0x245   :  { %2128 = vpow2.f32 %v1925_v57  ;;  %v1173_v62 = vadd.f32 %v1172_v59, %v960_v39  ;;  %v1185_v63 = vpop.f32.mrf.mxu3  ;;  %v2111_v59 = vld [vmem:[%s2456_s7] ss:$0 sm:$0xff] }
 0x246   :  { %v1186_v0 = vadd.f32 %v1185_v63, %v973_v42  ;;  %v1161_v1 = vpop.f32.mrf.mxu1  ;;  %v710_v42 = vld [vmem:[#allocation5 + $0x18] sm:$0xff] }
 0x247   :  { %v1214_v2 = vadd.f32 %v1206_v58, %v1173_v62  ;;  %v1200_v3 = vpop.f32.mrf.mxu0 }
 0x248   :  { %v1215_v5 = vadd.f32 %v1207_v60, %v1186_v0 }
 0x249   :  { %v1926_v6 = vmul.f32 -1.442695, %v1214_v2 }
 0x24a   :  { %v1927_v7 = vmul.f32 -1.442695, %v1215_v5 }
 0x24b   :  { %v2129_v8 = vpop.eup %2128  ;;  %2130 = vpow2.f32 %v1926_v6 }
 0x24c   :  { %v1226_v10 = vadd.f32 1.0, %v2129_v8  ;;  %2132 = vpow2.f32 %v1927_v7  ;;  %v1174_v11 = vpop.f32.mrf.mxu2 }
 0x24d   :  { %v1187_v12 = vpop.f32.mrf.mxu3 }
 0x24e   :  { %2134 = vrcp.f32 %v1226_v10  ;;  %v1240_v25 = vand.u32 2147483648, %v1226_v10  ;;  %vm1234_vm15 = vweird.f32 %v1226_v10  ;;  %v1238_v27 = vand.u32 2147483647, %v1226_v10 }
 0x250   :  { %v1241_v33 = vor.u32 1.1754944e-38, %v1240_v25  ;;  %vm1239_vm2 = vcmp.eq.f32.partialorder %v1238_v27, 8.507059e+37 }
 0x251   :  { %v2131_v17 = vpop.eup %2130 }
 0x252   :  { %v2133_v37 = vpop.eup %2132  ;;  %v1227_v13 = vadd.f32 1.0, %v2131_v17 }
 0x253   :  { %v1228_v14 = vadd.f32 1.0, %v2133_v37 }
 0x254   :  { %v2135_v15 = vpop.eup %2134  ;;  %2136 = vrcp.f32 %v1227_v13  ;;  %v1255_v29 = vand.u32 2147483648, %v1227_v13  ;;  %v1253_v32 = vand.u32 2147483647, %v1227_v13  ;;  %vm1249_vm3 = vweird.f32 %v1227_v13 }
 0x255   :  { %v1230_v40 = vmul.f32 %v2135_v15, %v1226_v10  ;;  %2138 = vrcp.f32 %v1228_v14  ;;  %vm1235_vm14 = vweird.f32 %v2135_v15  ;;  %v1270_v52 = vand.u32 2147483648, %v1228_v14 }
 0x256   :  { %vm1236_vm0 = vmor %vm1234_vm15, %vm1235_vm14  ;;  %2140 = vtanh.f32 %v1216_v22  ;;  %v1256_v39 = vor.u32 1.1754944e-38, %v1255_v29  ;;  %vm1254_vm5 = vcmp.eq.f32.partialorder %v1253_v32, 8.507059e+37  ;;  %vm1264_vm7 = vweird.f32 %v1228_v14 }
 0x257   :  { %v1231_v19 = vsub.f32 1.0, %v1230_v40  ;;  %v1268_v38 = vand.u32 2147483647, %v1228_v14  ;;  %v1271_v54 = vor.u32 1.1754944e-38, %v1270_v52 }
 0x259   :  { %v1232_v20 = vmul.f32 %v2135_v15, %v1231_v19  ;;  %vm1269_vm9 = vcmp.eq.f32.partialorder %v1268_v38, 8.507059e+37 }
 0x25a   :  { %v2137_v21 = vpop.eup %2136 }
 0x25b   :  { %v2139_v23 = vpop.eup %2138  ;;  %v1233_v41 = vadd.f32 %v2135_v15, %v1232_v20  ;;  %v1245_v24 = vmul.f32 %v2137_v21, %v1227_v13  ;;  %vm1250_vm1 = vweird.f32 %v2137_v21 }
 0x25c   :  { %v1260_v26 = vmul.f32 %v2139_v23, %v1228_v14  ;;  %vm1251_vm4 = vmor %vm1249_vm3, %vm1250_vm1  ;;  %v2141_v45 = vpop.eup %2140  ;;  %vm1265_vm6 = vweird.f32 %v2139_v23 }
 0x25d   :  { %v1246_v28 = vsub.f32 1.0, %v1245_v24  ;;  %v1237_v30 = vsel %vm1236_vm0, %v2135_v15, %v1233_v41  ;;  %vm1266_vm8 = vmor %vm1264_vm7, %vm1265_vm6 }
 0x25e   :  { %v1261_v34 = vsub.f32 1.0, %v1260_v26  ;;  %v1242_v36 = vsel %vm1239_vm2, %v1241_v33, %v1237_v30 }
 0x25f   :  { %v1247_v31 = vmul.f32 %v2137_v21, %v1246_v28  ;;  %v1276_v48 = vmul.f32 %v2141_v45, %v1242_v36 }
 0x260   :  { %v1262_v47 = vmul.f32 %v2139_v23, %v1261_v34 }
 0x261   :  { %v1248_v35 = vadd.f32 %v2137_v21, %v1247_v31 }
 0x262   :  { %v1263_v51 = vadd.f32 %v2139_v23, %v1262_v47 }
 0x263   :  { %v1252_v44 = vsel %vm1251_vm4, %v2137_v21, %v1248_v35 }
 0x264   :  { %v1257_v46 = vsel %vm1254_vm5, %v1256_v39, %v1252_v44  ;;  %v1267_v53 = vsel %vm1266_vm8, %v2139_v23, %v1263_v51 }
 0x265   :  { %v1275_v49 = vmul.f32 %v1257_v46, %v710_v42  ;;  %v1272_v56 = vsel %vm1269_vm9, %v1271_v54, %v1267_v53 }
 0x267   :  { %v1277_v50 = vadd.f32 %v1276_v48, %v1275_v49 }
 0x269   :  { %2142 = vtanh.f32 %v1277_v50  ;;  %1281 = vst [vmem:[#allocation11 + $0x18] sm:$0xff] %v1277_v50 }
 0x26f   :  { %v2143_v55 = vpop.eup %2142 }
 0x270   :  { %v1279_v57 = vmul.f32 %v2143_v55, %v1272_v56 }
 0x272   :  { %1280 = vst [vmem:[#allocation11 + $0x8] sm:$0xff] %v1279_v57  ;;  %v1282_v58 = vpack.c.bf16 %v1279_v57, %v1279_v57 }
 0x273   :  { %1386 = dma.vmem_to_hbm [thread:$0]  %s1382_s1, 512, %s1384_s29, [#allocation12]  }
 0x274   :  { %1359 = vmatmul.bf16.vlgmr.msra.gmra.mxu1 %v1282_v58 }
 0x2f1   :  { %v1360_v60 = vpop.f32.mrf.mxu1 }
 0x2f2   :  { %v1361_v61 = vadd.f32 %v2111_v59, %v1360_v60 }
 0x2f4   :  { %1364 = vst [vmem:[#allocation10] sm:$0xff] %v1361_v61 }
 0x2f5   :  { %1375 = dma.vmem_to_hbm [thread:$0]  %s1371_s0, 128, %s1373_s12, [#allocation4]  }
 0x2f9   :  { %v1362_v62 = vpop.f32.mrf.mxu1 }
 0x2fa   :  { %2294 = dma.done.wait [#allocation4], 128  }
 0x2fb   :  { %2295 = vsyncadd [#allocation4], 4294967168 }
 0x2fc   :  { %2296 = dma.done.wait [#allocation12], 512  }
 0x2fd   :  { %2297 = vsyncadd [#allocation12], 4294966784 }
 0x2fe   :  { %1395 = vsyncpa [#allocation3], 1 }
 0x2ff   :  { %1396 = vsyncpa [#allocation6], 1 }
 0x300   :  { %1397 = vsyncpa [#allocation9], 1 }
 0x301   :  { %1398 = vsyncpa [#allocation4], 1 }
 0x302   :  { %1399 = vsyncpa [#allocation12], 1 }

</bundles_post_ra>
